<compile_context>
chip_gen: v6e
topology: v6e:2x2x1
jax: 0.10.0
libtpu: 0.0.40
codegen_flags: <defaults>
</compile_context>

<pallas_src>
import jax
import jax.numpy as jnp
from jax.experimental import pallas as pl
from jax.experimental.pallas import tpu as pltpu

HIDDEN = 32
INPUT_DIM = 16
OUTPUT_DIM = 16
NUM_LAYERS = 4
HEAD_DIM = OUTPUT_DIM + 2            # token(16) | q_write(1) | q_read(1)

# Indices into the packed (NSLABS, 32, 32) weight slab / (NSLABS, 1, 32) bias slab.
def _ih(l, g):                       # input->hidden weight, layer l, gate g (r,z,n)
    return l * 3 + g

def _hh(l, g):                       # hidden->hidden weight, layer l, gate g
    return 3 * NUM_LAYERS + l * 3 + g

W_DENSE = 6 * NUM_LAYERS             # 24
W_HEAD = W_DENSE + 1                 # 25 (fused [token | q_write | q_read], lane-padded)
NSLABS = W_HEAD + 1                  # 26


def rlst_kernel(xy_ref, h0_ref, w_ref, b_ref, head_ref, h_ref):
    """One decode step for one batch tile.

    h_ref is an output block whose index_map is constant along the T grid axis,
    so it stays VMEM-resident and doubles as the carried GRU hidden state.
    """
    t = pl.program_id(1)

    @pl.when(t == 0)
    def _init():
        h_ref[...] = h0_ref[...]

    xy = xy_ref[0]                                            # (BT, 32) raw [x|y]

    def dot(a, b):
        return jnp.dot(a, b, preferred_element_type=jnp.float32)

    # Pre-step hidden rows: free leading-index views at lane offset 0.
    h_prev = [h_ref[l] for l in range(NUM_LAYERS)]

    # Hidden->hidden gate pre-activations for all layers/gates, hoisted off the
    # serial layer chain (they depend only on the pre-step hidden state).
    gh = [[dot(h_prev[l], w_ref[_hh(l, g)]) + b_ref[_hh(l, g)] for g in range(3)]
          for l in range(NUM_LAYERS)]

    layer_in = xy
    for l in range(NUM_LAYERS):
        # Per-gate (BT, 32) matmuls keep r / z / n / h_prev at identical lane
        # positions -> all GRU elementwise math below is lane-aligned VPU work.
        gi_r = dot(layer_in, w_ref[_ih(l, 0)]) + b_ref[_ih(l, 0)]
        gi_z = dot(layer_in, w_ref[_ih(l, 1)]) + b_ref[_ih(l, 1)]
        gi_n = dot(layer_in, w_ref[_ih(l, 2)]) + b_ref[_ih(l, 2)]
        r = jax.nn.sigmoid(gi_r + gh[l][0])
        z = jax.nn.sigmoid(gi_z + gh[l][1])
        n = jnp.tanh(gi_n + r * gh[l][2])                     # b_hn stays inside r*(.)
        h_new = (1.0 - z) * n + z * h_prev[l]
        h_ref[l] = h_new                                      # aligned per-layer row store
        layer_in = h_new

    # dense -> LeakyReLU(0.01) -> fused [token | q_write | q_read] head.
    d = dot(layer_in, w_ref[W_DENSE]) + b_ref[W_DENSE]
    d = jnp.where(d > 0, d, 0.01 * d)
    head_ref[0] = dot(d, w_ref[W_HEAD]) + b_ref[W_HEAD]       # (BT, 32), cols 0:18 live


def init_params(key):
    """Deterministic synthetic parameters (PyTorch-ish uniform(-1/sqrt(fan_in), .))."""
    H = HIDDEN
    ks = list(jax.random.split(key, 16))

    def u(k, shape, fan_in):
        bound = 1.0 / jnp.sqrt(jnp.float32(fan_in))
        return jax.random.uniform(k, shape, jnp.float32, -bound, bound)

    return (
        u(ks[0], (INPUT_DIM, H), INPUT_DIM),       # w_emb_in
        u(ks[1], (1, H), INPUT_DIM),               # b_emb_in
        u(ks[2], (OUTPUT_DIM, H), OUTPUT_DIM),     # w_emb_out
        u(ks[3], (1, H), OUTPUT_DIM),              # b_emb_out
        u(ks[4], (2 * H, 3 * H), H),               # w_ih layer 0 (64, 96)
        u(ks[5], (NUM_LAYERS - 1, H, 3 * H), H),   # w_ih layers 1..3
        u(ks[6], (NUM_LAYERS, H, 3 * H), H),       # w_hh all layers
        u(ks[7], (NUM_LAYERS, 3 * H), H),          # b_ih all layers
        u(ks[8], (NUM_LAYERS, 3 * H), H),          # b_hh all layers
        u(ks[9], (H, H), H),                       # w_dense
        u(ks[10], (1, H), H),                      # b_dense
        u(ks[11], (H, OUTPUT_DIM), H),             # w_tok
        u(ks[12], (1, OUTPUT_DIM), H),             # b_tok
        u(ks[13], (H, 1), H),                      # w_q_write
        u(ks[14], (1, 1), H),                      # b_q_write
        u(ks[15], (H, 1), H),                      # w_q_read
        jnp.zeros((1, 1), jnp.float32),            # b_q_read
    )


def pack_params(params):
    """One-time offline fold + repack into two slabs: (26,32,32) weights, (26,1,32) biases."""
    (w_ei, b_ei, w_eo, b_eo, w_ih0, w_ih_rest, w_hh, b_ih, b_hh,
     w_d, b_d, w_t, b_t, w_qw, b_qw, w_qr, b_qr) = params
    H = HIDDEN
    hp = jax.lax.Precision.HIGHEST

    # Fold input/output embedding Linears into the layer-0 GRU input weight/bias.
    w0_x = jnp.dot(w_ei, w_ih0[0:H, :], precision=hp)            # (16, 96)
    w0_y = jnp.dot(w_eo, w_ih0[H:2 * H, :], precision=hp)        # (16, 96)
    w0 = jnp.concatenate([w0_x, w0_y], axis=0)                   # (32, 96)
    b0 = (jnp.dot(b_ei, w_ih0[0:H, :], precision=hp)
          + jnp.dot(b_eo, w_ih0[H:2 * H, :], precision=hp)
          + b_ih[0:1, :])                                        # (1, 96)

    w_all = jnp.zeros((NSLABS, H, H), jnp.float32)
    b_all = jnp.zeros((NSLABS, 1, H), jnp.float32)
    for l in range(NUM_LAYERS):
        wi = w0 if l == 0 else w_ih_rest[l - 1]                  # (32, 96)
        bi = b0[0] if l == 0 else b_ih[l]                        # (96,)
        for g in range(3):                                       # PyTorch gate order r,z,n
            sl = slice(g * H, (g + 1) * H)
            w_all = w_all.at[_ih(l, g)].set(wi[:, sl])
            b_all = b_all.at[_ih(l, g), 0].set(bi[sl])
            w_all = w_all.at[_hh(l, g)].set(w_hh[l][:, sl])
            b_all = b_all.at[_hh(l, g), 0].set(b_hh[l][sl])

    w_all = w_all.at[W_DENSE].set(w_d)
    b_all = b_all.at[W_DENSE, 0].set(b_d[0])
    w_head = jnp.concatenate([w_t, w_qw, w_qr], axis=1)          # (32, 18)
    b_head = jnp.concatenate([b_t, b_qw, b_qr], axis=1)          # (1, 18)
    w_all = w_all.at[W_HEAD, :, 0:HEAD_DIM].set(w_head)
    b_all = b_all.at[W_HEAD, 0, 0:HEAD_DIM].set(b_head[0])
    return w_all, b_all


def rlst_forward_seq(x_seq, y_seq, hidden, packed, *, batch_tile=8):
    """T decode steps of RLST.forward with the hidden state carried in VMEM.

    x_seq: (T, B, INPUT_DIM), y_seq: (T, B, OUTPUT_DIM), hidden: (L, B, HIDDEN).
    Per step / per batch row this is exactly the module forward (eval mode).
    Returns (token_pred (T,B,OUT), q_w (T,B,1), q_r (T,B,1), hidden (L,B,H)).
    """
    w_all, b_all = packed
    T, B, _ = x_seq.shape
    assert B % batch_tile == 0, "batch must be a multiple of the 8-sublane tile"
    nb = B // batch_tile

    xy = jnp.concatenate([x_seq, y_seq], axis=-1).astype(jnp.float32)  # (T, B, 32)
    h0 = hidden.astype(jnp.float32)                                    # (L, B, 32)

    head_seq, h_fin = pl.pallas_call(
        rlst_kernel,
        grid=(nb, T),
        in_specs=[
            pl.BlockSpec((1, batch_tile, INPUT_DIM + OUTPUT_DIM),
                         lambda b, t: (t, b, 0)),
            pl.BlockSpec((NUM_LAYERS, batch_tile, HIDDEN), lambda b, t: (0, b, 0)),
            pl.BlockSpec((NSLABS, HIDDEN, HIDDEN), lambda b, t: (0, 0, 0)),
            pl.BlockSpec((NSLABS, 1, HIDDEN), lambda b, t: (0, 0, 0)),
        ],
        out_specs=(
            pl.BlockSpec((1, batch_tile, HIDDEN), lambda b, t: (t, b, 0)),
            pl.BlockSpec((NUM_LAYERS, batch_tile, HIDDEN), lambda b, t: (0, b, 0)),
        ),
        out_shape=(
            jax.ShapeDtypeStruct((T, B, HIDDEN), jnp.float32),
            jax.ShapeDtypeStruct((NUM_LAYERS, B, HIDDEN), jnp.float32),
        ),
        compiler_params=pltpu.CompilerParams(
            dimension_semantics=("parallel", "arbitrary")),
    )(xy, h0, w_all, b_all)

    tok = head_seq[..., 0:OUTPUT_DIM]
    qw = head_seq[..., OUTPUT_DIM:OUTPUT_DIM + 1]
    qr = head_seq[..., OUTPUT_DIM + 1:OUTPUT_DIM + 2]
    return tok, qw, qr, h_fin


def rlst_reference_seq(x_seq, y_seq, hidden, params):
    """Plain-JAX reference: the original (unfused) module math, looped over T, eval mode."""
    (w_ei, b_ei, w_eo, b_eo, w_ih0, w_ih_rest, w_hh, b_ih, b_hh,
     w_d, b_d, w_t, b_t, w_qw, b_qw, w_qr, b_qr) = params
    H = HIDDEN
    hp = jax.lax.Precision.HIGHEST
    dot = lambda a, b: jnp.dot(a, b, precision=hp)

    h = hidden
    toks, qws, qrs = [], [], []
    for t in range(x_seq.shape[0]):
        xe = dot(x_seq[t], w_ei) + b_ei
        ye = dot(y_seq[t], w_eo) + b_eo
        layer_in = jnp.concatenate([xe, ye], axis=-1)
        new_h = []
        for l in range(NUM_LAYERS):
            w_ih_l = w_ih0 if l == 0 else w_ih_rest[l - 1]
            gi = dot(layer_in, w_ih_l) + b_ih[l]
            gh = dot(h[l], w_hh[l]) + b_hh[l]
            r = jax.nn.sigmoid(gi[:, :H] + gh[:, :H])
            z = jax.nn.sigmoid(gi[:, H:2 * H] + gh[:, H:2 * H])
            n = jnp.tanh(gi[:, 2 * H:] + r * gh[:, 2 * H:])
            hn = (1.0 - z) * n + z * h[l]
            new_h.append(hn)
            layer_in = hn
        h = jnp.stack(new_h, axis=0)
        d = dot(layer_in, w_d) + b_d
        d = jnp.where(d > 0, d, 0.01 * d)
        toks.append(dot(d, w_t) + b_t)
        qws.append(dot(d, w_qw) + b_qw)
        qrs.append(dot(d, w_qr) + b_qr)
    return (jnp.stack(toks, 0), jnp.stack(qws, 0), jnp.stack(qrs, 0), h)


if __name__ == "__main__":
    key = jax.random.PRNGKey(0)
    k_x, k_y, k_h, k_p = jax.random.split(key, 4)

    T, B = 8, 16                 # decode steps, batch (= 2 x 8-sublane tiles)
    x_seq = jax.random.normal(k_x, (T, B, INPUT_DIM), jnp.float32)
    y_seq = jax.random.normal(k_y, (T, B, OUTPUT_DIM), jnp.float32)
    hidden = jax.random.normal(k_h, (NUM_LAYERS, B, HIDDEN), jnp.float32)

    raw_params = init_params(k_p)
    packed = pack_params(raw_params)          # one-time offline fold / repack

    outs = rlst_forward_seq(x_seq, y_seq, hidden, packed)
    outs = jax.block_until_ready(outs)

    refs = rlst_reference_seq(x_seq, y_seq, hidden, raw_params)
    for o, r in zip(outs, refs):
        assert o.shape == r.shape, (o.shape, r.shape)
        # Tolerance covers f32-MXU vs exact-f32 rounding accumulated over the
        # 8-step recurrence and the offline embedding fold re-association.
        assert jnp.allclose(o, r, atol=5e-3, rtol=5e-3), "mismatch vs reference"

    print("KERNEL_OK")
</pallas_src>

<mosaic_0001>
module attributes {stable_mosaic.version = 11 : i64} {
  func.func @rlst_kernel(%arg0: i32, %arg1: i32, %arg2: memref<1x8x32xf32, #tpu.memory_space<vmem>>, %arg3: memref<4x8x32xf32, #tpu.memory_space<vmem>>, %arg4: memref<26x32x32xf32, #tpu.memory_space<vmem>>, %arg5: memref<26x1x32xf32, #tpu.memory_space<vmem>>, %arg6: memref<1x8x32xf32, #tpu.memory_space<vmem>>, %arg7: memref<4x8x32xf32, #tpu.memory_space<vmem>>) attributes {dimension_semantics = [#tpu.dimension_semantics<parallel>, #tpu.dimension_semantics<arbitrary>], iteration_bounds = array<i64: 2, 8>, scalar_prefetch = 0 : i64, scratch_operands = 0 : i64, tpu.core_type = #tpu.core_type<tc>, window_params = [{transform_indices = @transform_0, window_bounds = array<i64: 1, 8, 32>}, {transform_indices = @transform_1, window_bounds = array<i64: 4, 8, 32>}, {pipeline_mode = #tpu.pipeline_mode<synchronous>, transform_indices = @transform_2, window_bounds = array<i64: 26, 32, 32>}, {pipeline_mode = #tpu.pipeline_mode<synchronous>, transform_indices = @transform_3, window_bounds = array<i64: 26, 1, 32>}, {transform_indices = @transform_4, window_bounds = array<i64: 1, 8, 32>}, {transform_indices = @transform_5, window_bounds = array<i64: 4, 8, 32>}]} {
    %c0_i32 = arith.constant 0 : i32
    %0 = arith.cmpi eq, %arg1, %c0_i32 : i32
    %1 = arith.extui %0 : i1 to i32
    %c0_i32_0 = arith.constant 0 : i32
    %2 = arith.cmpi ne, %1, %c0_i32_0 : i32
    scf.if %2 {
      %c0_200 = arith.constant 0 : index
      %c0_201 = arith.constant 0 : index
      %c0_202 = arith.constant 0 : index
      %295 = vector.load %arg3[%c0_200, %c0_201, %c0_202] : memref<4x8x32xf32, #tpu.memory_space<vmem>>, vector<4x8x32xf32>
      %c0_203 = arith.constant 0 : index
      %c0_204 = arith.constant 0 : index
      %c0_205 = arith.constant 0 : index
      %296 = vector.load %arg7[%c0_203, %c0_204, %c0_205] : memref<4x8x32xf32, #tpu.memory_space<vmem>>, vector<4x8x32xf32>
      tpu.vector_store %arg7[%c0_203, %c0_204, %c0_205], %295 {strides = array<i32>} : memref<4x8x32xf32, #tpu.memory_space<vmem>>, vector<4x8x32xf32>,
    } else {
    }
    %c0 = arith.constant 0 : index
    %c0_1 = arith.constant 0 : index
    %c0_2 = arith.constant 0 : index
    %3 = vector.load %arg2[%c0, %c0_1, %c0_2] : memref<1x8x32xf32, #tpu.memory_space<vmem>>, vector<1x8x32xf32>
    %4 = vector.shape_cast %3 : vector<1x8x32xf32> to vector<8x32xf32>
    %c0_3 = arith.constant 0 : index
    %c0_4 = arith.constant 0 : index
    %c0_5 = arith.constant 0 : index
    %5 = vector.load %arg7[%c0_3, %c0_4, %c0_5] : memref<4x8x32xf32, #tpu.memory_space<vmem>>, vector<1x8x32xf32>
    %6 = vector.shape_cast %5 : vector<1x8x32xf32> to vector<8x32xf32>
    %c1 = arith.constant 1 : index
    %c0_6 = arith.constant 0 : index
    %c0_7 = arith.constant 0 : index
    %7 = vector.load %arg7[%c1, %c0_6, %c0_7] : memref<4x8x32xf32, #tpu.memory_space<vmem>>, vector<1x8x32xf32>
    %8 = vector.shape_cast %7 : vector<1x8x32xf32> to vector<8x32xf32>
    %c2 = arith.constant 2 : index
    %c0_8 = arith.constant 0 : index
    %c0_9 = arith.constant 0 : index
    %9 = vector.load %arg7[%c2, %c0_8, %c0_9] : memref<4x8x32xf32, #tpu.memory_space<vmem>>, vector<1x8x32xf32>
    %10 = vector.shape_cast %9 : vector<1x8x32xf32> to vector<8x32xf32>
    %c3 = arith.constant 3 : index
    %c0_10 = arith.constant 0 : index
    %c0_11 = arith.constant 0 : index
    %11 = vector.load %arg7[%c3, %c0_10, %c0_11] : memref<4x8x32xf32, #tpu.memory_space<vmem>>, vector<1x8x32xf32>
    %12 = vector.shape_cast %11 : vector<1x8x32xf32> to vector<8x32xf32>
    %c12 = arith.constant 12 : index
    %c0_12 = arith.constant 0 : index
    %c0_13 = arith.constant 0 : index
    %13 = vector.load %arg4[%c12, %c0_12, %c0_13] : memref<26x32x32xf32, #tpu.memory_space<vmem>>, vector<1x32x32xf32>
    %14 = vector.shape_cast %13 : vector<1x32x32xf32> to vector<32x32xf32>
    %cst = arith.constant dense<0.000000e+00> : vector<8x32xf32>
    %15 = tpu.matmul %6, %14, %cst {dimension_numbers = #tpu.dot_dimension_numbers<[1], [0], [0], [1], [0, 0, 1, 1], [], []>} : vector<8x32xf32>, vector<32x32xf32>, vector<8x32xf32> -> vector<8x32xf32>
    %c12_14 = arith.constant 12 : index
    %c0_15 = arith.constant 0 : index
    %c0_16 = arith.constant 0 : index
    %16 = vector.load %arg5[%c12_14, %c0_15, %c0_16] : memref<26x1x32xf32, #tpu.memory_space<vmem>>, vector<1x1x32xf32>
    %17 = vector.shape_cast %16 : vector<1x1x32xf32> to vector<1x32xf32>
    %18 = vector.broadcast %17 : vector<1x32xf32> to vector<8x32xf32>
    %19 = arith.addf %15, %18 : vector<8x32xf32>
    %c13 = arith.constant 13 : index
    %c0_17 = arith.constant 0 : index
    %c0_18 = arith.constant 0 : index
    %20 = vector.load %arg4[%c13, %c0_17, %c0_18] : memref<26x32x32xf32, #tpu.memory_space<vmem>>, vector<1x32x32xf32>
    %21 = vector.shape_cast %20 : vector<1x32x32xf32> to vector<32x32xf32>
    %cst_19 = arith.constant dense<0.000000e+00> : vector<8x32xf32>
    %22 = tpu.matmul %6, %21, %cst_19 {dimension_numbers = #tpu.dot_dimension_numbers<[1], [0], [0], [1], [0, 0, 1, 1], [], []>} : vector<8x32xf32>, vector<32x32xf32>, vector<8x32xf32> -> vector<8x32xf32>
    %c13_20 = arith.constant 13 : index
    %c0_21 = arith.constant 0 : index
    %c0_22 = arith.constant 0 : index
    %23 = vector.load %arg5[%c13_20, %c0_21, %c0_22] : memref<26x1x32xf32, #tpu.memory_space<vmem>>, vector<1x1x32xf32>
    %24 = vector.shape_cast %23 : vector<1x1x32xf32> to vector<1x32xf32>
    %25 = vector.broadcast %24 : vector<1x32xf32> to vector<8x32xf32>
    %26 = arith.addf %22, %25 : vector<8x32xf32>
    %c14 = arith.constant 14 : index
    %c0_23 = arith.constant 0 : index
    %c0_24 = arith.constant 0 : index
    %27 = vector.load %arg4[%c14, %c0_23, %c0_24] : memref<26x32x32xf32, #tpu.memory_space<vmem>>, vector<1x32x32xf32>
    %28 = vector.shape_cast %27 : vector<1x32x32xf32> to vector<32x32xf32>
    %cst_25 = arith.constant dense<0.000000e+00> : vector<8x32xf32>
    %29 = tpu.matmul %6, %28, %cst_25 {dimension_numbers = #tpu.dot_dimension_numbers<[1], [0], [0], [1], [0, 0, 1, 1], [], []>} : vector<8x32xf32>, vector<32x32xf32>, vector<8x32xf32> -> vector<8x32xf32>
    %c14_26 = arith.constant 14 : index
    %c0_27 = arith.constant 0 : index
    %c0_28 = arith.constant 0 : index
    %30 = vector.load %arg5[%c14_26, %c0_27, %c0_28] : memref<26x1x32xf32, #tpu.memory_space<vmem>>, vector<1x1x32xf32>
    %31 = vector.shape_cast %30 : vector<1x1x32xf32> to vector<1x32xf32>
    %32 = vector.broadcast %31 : vector<1x32xf32> to vector<8x32xf32>
    %33 = arith.addf %29, %32 : vector<8x32xf32>
    %c15 = arith.constant 15 : index
    %c0_29 = arith.constant 0 : index
    %c0_30 = arith.constant 0 : index
    %34 = vector.load %arg4[%c15, %c0_29, %c0_30] : memref<26x32x32xf32, #tpu.memory_space<vmem>>, vector<1x32x32xf32>
    %35 = vector.shape_cast %34 : vector<1x32x32xf32> to vector<32x32xf32>
    %cst_31 = arith.constant dense<0.000000e+00> : vector<8x32xf32>
    %36 = tpu.matmul %8, %35, %cst_31 {dimension_numbers = #tpu.dot_dimension_numbers<[1], [0], [0], [1], [0, 0, 1, 1], [], []>} : vector<8x32xf32>, vector<32x32xf32>, vector<8x32xf32> -> vector<8x32xf32>
    %c15_32 = arith.constant 15 : index
    %c0_33 = arith.constant 0 : index
    %c0_34 = arith.constant 0 : index
    %37 = vector.load %arg5[%c15_32, %c0_33, %c0_34] : memref<26x1x32xf32, #tpu.memory_space<vmem>>, vector<1x1x32xf32>
    %38 = vector.shape_cast %37 : vector<1x1x32xf32> to vector<1x32xf32>
    %39 = vector.broadcast %38 : vector<1x32xf32> to vector<8x32xf32>
    %40 = arith.addf %36, %39 : vector<8x32xf32>
    %c16 = arith.constant 16 : index
    %c0_35 = arith.constant 0 : index
    %c0_36 = arith.constant 0 : index
    %41 = vector.load %arg4[%c16, %c0_35, %c0_36] : memref<26x32x32xf32, #tpu.memory_space<vmem>>, vector<1x32x32xf32>
    %42 = vector.shape_cast %41 : vector<1x32x32xf32> to vector<32x32xf32>
    %cst_37 = arith.constant dense<0.000000e+00> : vector<8x32xf32>
    %43 = tpu.matmul %8, %42, %cst_37 {dimension_numbers = #tpu.dot_dimension_numbers<[1], [0], [0], [1], [0, 0, 1, 1], [], []>} : vector<8x32xf32>, vector<32x32xf32>, vector<8x32xf32> -> vector<8x32xf32>
    %c16_38 = arith.constant 16 : index
    %c0_39 = arith.constant 0 : index
    %c0_40 = arith.constant 0 : index
    %44 = vector.load %arg5[%c16_38, %c0_39, %c0_40] : memref<26x1x32xf32, #tpu.memory_space<vmem>>, vector<1x1x32xf32>
    %45 = vector.shape_cast %44 : vector<1x1x32xf32> to vector<1x32xf32>
    %46 = vector.broadcast %45 : vector<1x32xf32> to vector<8x32xf32>
    %47 = arith.addf %43, %46 : vector<8x32xf32>
    %c17 = arith.constant 17 : index
    %c0_41 = arith.constant 0 : index
    %c0_42 = arith.constant 0 : index
    %48 = vector.load %arg4[%c17, %c0_41, %c0_42] : memref<26x32x32xf32, #tpu.memory_space<vmem>>, vector<1x32x32xf32>
    %49 = vector.shape_cast %48 : vector<1x32x32xf32> to vector<32x32xf32>
    %cst_43 = arith.constant dense<0.000000e+00> : vector<8x32xf32>
    %50 = tpu.matmul %8, %49, %cst_43 {dimension_numbers = #tpu.dot_dimension_numbers<[1], [0], [0], [1], [0, 0, 1, 1], [], []>} : vector<8x32xf32>, vector<32x32xf32>, vector<8x32xf32> -> vector<8x32xf32>
    %c17_44 = arith.constant 17 : index
    %c0_45 = arith.constant 0 : index
    %c0_46 = arith.constant 0 : index
    %51 = vector.load %arg5[%c17_44, %c0_45, %c0_46] : memref<26x1x32xf32, #tpu.memory_space<vmem>>, vector<1x1x32xf32>
    %52 = vector.shape_cast %51 : vector<1x1x32xf32> to vector<1x32xf32>
    %53 = vector.broadcast %52 : vector<1x32xf32> to vector<8x32xf32>
    %54 = arith.addf %50, %53 : vector<8x32xf32>
    %c18 = arith.constant 18 : index
    %c0_47 = arith.constant 0 : index
    %c0_48 = arith.constant 0 : index
    %55 = vector.load %arg4[%c18, %c0_47, %c0_48] : memref<26x32x32xf32, #tpu.memory_space<vmem>>, vector<1x32x32xf32>
    %56 = vector.shape_cast %55 : vector<1x32x32xf32> to vector<32x32xf32>
    %cst_49 = arith.constant dense<0.000000e+00> : vector<8x32xf32>
    %57 = tpu.matmul %10, %56, %cst_49 {dimension_numbers = #tpu.dot_dimension_numbers<[1], [0], [0], [1], [0, 0, 1, 1], [], []>} : vector<8x32xf32>, vector<32x32xf32>, vector<8x32xf32> -> vector<8x32xf32>
    %c18_50 = arith.constant 18 : index
    %c0_51 = arith.constant 0 : index
    %c0_52 = arith.constant 0 : index
    %58 = vector.load %arg5[%c18_50, %c0_51, %c0_52] : memref<26x1x32xf32, #tpu.memory_space<vmem>>, vector<1x1x32xf32>
    %59 = vector.shape_cast %58 : vector<1x1x32xf32> to vector<1x32xf32>
    %60 = vector.broadcast %59 : vector<1x32xf32> to vector<8x32xf32>
    %61 = arith.addf %57, %60 : vector<8x32xf32>
    %c19 = arith.constant 19 : index
    %c0_53 = arith.constant 0 : index
    %c0_54 = arith.constant 0 : index
    %62 = vector.load %arg4[%c19, %c0_53, %c0_54] : memref<26x32x32xf32, #tpu.memory_space<vmem>>, vector<1x32x32xf32>
    %63 = vector.shape_cast %62 : vector<1x32x32xf32> to vector<32x32xf32>
    %cst_55 = arith.constant dense<0.000000e+00> : vector<8x32xf32>
    %64 = tpu.matmul %10, %63, %cst_55 {dimension_numbers = #tpu.dot_dimension_numbers<[1], [0], [0], [1], [0, 0, 1, 1], [], []>} : vector<8x32xf32>, vector<32x32xf32>, vector<8x32xf32> -> vector<8x32xf32>
    %c19_56 = arith.constant 19 : index
    %c0_57 = arith.constant 0 : index
    %c0_58 = arith.constant 0 : index
    %65 = vector.load %arg5[%c19_56, %c0_57, %c0_58] : memref<26x1x32xf32, #tpu.memory_space<vmem>>, vector<1x1x32xf32>
    %66 = vector.shape_cast %65 : vector<1x1x32xf32> to vector<1x32xf32>
    %67 = vector.broadcast %66 : vector<1x32xf32> to vector<8x32xf32>
    %68 = arith.addf %64, %67 : vector<8x32xf32>
    %c20 = arith.constant 20 : index
    %c0_59 = arith.constant 0 : index
    %c0_60 = arith.constant 0 : index
    %69 = vector.load %arg4[%c20, %c0_59, %c0_60] : memref<26x32x32xf32, #tpu.memory_space<vmem>>, vector<1x32x32xf32>
    %70 = vector.shape_cast %69 : vector<1x32x32xf32> to vector<32x32xf32>
    %cst_61 = arith.constant dense<0.000000e+00> : vector<8x32xf32>
    %71 = tpu.matmul %10, %70, %cst_61 {dimension_numbers = #tpu.dot_dimension_numbers<[1], [0], [0], [1], [0, 0, 1, 1], [], []>} : vector<8x32xf32>, vector<32x32xf32>, vector<8x32xf32> -> vector<8x32xf32>
    %c20_62 = arith.constant 20 : index
    %c0_63 = arith.constant 0 : index
    %c0_64 = arith.constant 0 : index
    %72 = vector.load %arg5[%c20_62, %c0_63, %c0_64] : memref<26x1x32xf32, #tpu.memory_space<vmem>>, vector<1x1x32xf32>
    %73 = vector.shape_cast %72 : vector<1x1x32xf32> to vector<1x32xf32>
    %74 = vector.broadcast %73 : vector<1x32xf32> to vector<8x32xf32>
    %75 = arith.addf %71, %74 : vector<8x32xf32>
    %c21 = arith.constant 21 : index
    %c0_65 = arith.constant 0 : index
    %c0_66 = arith.constant 0 : index
    %76 = vector.load %arg4[%c21, %c0_65, %c0_66] : memref<26x32x32xf32, #tpu.memory_space<vmem>>, vector<1x32x32xf32>
    %77 = vector.shape_cast %76 : vector<1x32x32xf32> to vector<32x32xf32>
    %cst_67 = arith.constant dense<0.000000e+00> : vector<8x32xf32>
    %78 = tpu.matmul %12, %77, %cst_67 {dimension_numbers = #tpu.dot_dimension_numbers<[1], [0], [0], [1], [0, 0, 1, 1], [], []>} : vector<8x32xf32>, vector<32x32xf32>, vector<8x32xf32> -> vector<8x32xf32>
    %c21_68 = arith.constant 21 : index
    %c0_69 = arith.constant 0 : index
    %c0_70 = arith.constant 0 : index
    %79 = vector.load %arg5[%c21_68, %c0_69, %c0_70] : memref<26x1x32xf32, #tpu.memory_space<vmem>>, vector<1x1x32xf32>
    %80 = vector.shape_cast %79 : vector<1x1x32xf32> to vector<1x32xf32>
    %81 = vector.broadcast %80 : vector<1x32xf32> to vector<8x32xf32>
    %82 = arith.addf %78, %81 : vector<8x32xf32>
    %c22 = arith.constant 22 : index
    %c0_71 = arith.constant 0 : index
    %c0_72 = arith.constant 0 : index
    %83 = vector.load %arg4[%c22, %c0_71, %c0_72] : memref<26x32x32xf32, #tpu.memory_space<vmem>>, vector<1x32x32xf32>
    %84 = vector.shape_cast %83 : vector<1x32x32xf32> to vector<32x32xf32>
    %cst_73 = arith.constant dense<0.000000e+00> : vector<8x32xf32>
    %85 = tpu.matmul %12, %84, %cst_73 {dimension_numbers = #tpu.dot_dimension_numbers<[1], [0], [0], [1], [0, 0, 1, 1], [], []>} : vector<8x32xf32>, vector<32x32xf32>, vector<8x32xf32> -> vector<8x32xf32>
    %c22_74 = arith.constant 22 : index
    %c0_75 = arith.constant 0 : index
    %c0_76 = arith.constant 0 : index
    %86 = vector.load %arg5[%c22_74, %c0_75, %c0_76] : memref<26x1x32xf32, #tpu.memory_space<vmem>>, vector<1x1x32xf32>
    %87 = vector.shape_cast %86 : vector<1x1x32xf32> to vector<1x32xf32>
    %88 = vector.broadcast %87 : vector<1x32xf32> to vector<8x32xf32>
    %89 = arith.addf %85, %88 : vector<8x32xf32>
    %c23 = arith.constant 23 : index
    %c0_77 = arith.constant 0 : index
    %c0_78 = arith.constant 0 : index
    %90 = vector.load %arg4[%c23, %c0_77, %c0_78] : memref<26x32x32xf32, #tpu.memory_space<vmem>>, vector<1x32x32xf32>
    %91 = vector.shape_cast %90 : vector<1x32x32xf32> to vector<32x32xf32>
    %cst_79 = arith.constant dense<0.000000e+00> : vector<8x32xf32>
    %92 = tpu.matmul %12, %91, %cst_79 {dimension_numbers = #tpu.dot_dimension_numbers<[1], [0], [0], [1], [0, 0, 1, 1], [], []>} : vector<8x32xf32>, vector<32x32xf32>, vector<8x32xf32> -> vector<8x32xf32>
    %c23_80 = arith.constant 23 : index
    %c0_81 = arith.constant 0 : index
    %c0_82 = arith.constant 0 : index
    %93 = vector.load %arg5[%c23_80, %c0_81, %c0_82] : memref<26x1x32xf32, #tpu.memory_space<vmem>>, vector<1x1x32xf32>
    %94 = vector.shape_cast %93 : vector<1x1x32xf32> to vector<1x32xf32>
    %95 = vector.broadcast %94 : vector<1x32xf32> to vector<8x32xf32>
    %96 = arith.addf %92, %95 : vector<8x32xf32>
    %c0_83 = arith.constant 0 : index
    %c0_84 = arith.constant 0 : index
    %c0_85 = arith.constant 0 : index
    %97 = vector.load %arg4[%c0_83, %c0_84, %c0_85] : memref<26x32x32xf32, #tpu.memory_space<vmem>>, vector<1x32x32xf32>
    %98 = vector.shape_cast %97 : vector<1x32x32xf32> to vector<32x32xf32>
    %cst_86 = arith.constant dense<0.000000e+00> : vector<8x32xf32>
    %99 = tpu.matmul %4, %98, %cst_86 {dimension_numbers = #tpu.dot_dimension_numbers<[1], [0], [0], [1], [0, 0, 1, 1], [], []>} : vector<8x32xf32>, vector<32x32xf32>, vector<8x32xf32> -> vector<8x32xf32>
    %c0_87 = arith.constant 0 : index
    %c0_88 = arith.constant 0 : index
    %c0_89 = arith.constant 0 : index
    %100 = vector.load %arg5[%c0_87, %c0_88, %c0_89] : memref<26x1x32xf32, #tpu.memory_space<vmem>>, vector<1x1x32xf32>
    %101 = vector.shape_cast %100 : vector<1x1x32xf32> to vector<1x32xf32>
    %102 = vector.broadcast %101 : vector<1x32xf32> to vector<8x32xf32>
    %103 = arith.addf %99, %102 : vector<8x32xf32>
    %c1_90 = arith.constant 1 : index
    %c0_91 = arith.constant 0 : index
    %c0_92 = arith.constant 0 : index
    %104 = vector.load %arg4[%c1_90, %c0_91, %c0_92] : memref<26x32x32xf32, #tpu.memory_space<vmem>>, vector<1x32x32xf32>
    %105 = vector.shape_cast %104 : vector<1x32x32xf32> to vector<32x32xf32>
    %cst_93 = arith.constant dense<0.000000e+00> : vector<8x32xf32>
    %106 = tpu.matmul %4, %105, %cst_93 {dimension_numbers = #tpu.dot_dimension_numbers<[1], [0], [0], [1], [0, 0, 1, 1], [], []>} : vector<8x32xf32>, vector<32x32xf32>, vector<8x32xf32> -> vector<8x32xf32>
    %c1_94 = arith.constant 1 : index
    %c0_95 = arith.constant 0 : index
    %c0_96 = arith.constant 0 : index
    %107 = vector.load %arg5[%c1_94, %c0_95, %c0_96] : memref<26x1x32xf32, #tpu.memory_space<vmem>>, vector<1x1x32xf32>
    %108 = vector.shape_cast %107 : vector<1x1x32xf32> to vector<1x32xf32>
    %109 = vector.broadcast %108 : vector<1x32xf32> to vector<8x32xf32>
    %110 = arith.addf %106, %109 : vector<8x32xf32>
    %c2_97 = arith.constant 2 : index
    %c0_98 = arith.constant 0 : index
    %c0_99 = arith.constant 0 : index
    %111 = vector.load %arg4[%c2_97, %c0_98, %c0_99] : memref<26x32x32xf32, #tpu.memory_space<vmem>>, vector<1x32x32xf32>
    %112 = vector.shape_cast %111 : vector<1x32x32xf32> to vector<32x32xf32>
    %cst_100 = arith.constant dense<0.000000e+00> : vector<8x32xf32>
    %113 = tpu.matmul %4, %112, %cst_100 {dimension_numbers = #tpu.dot_dimension_numbers<[1], [0], [0], [1], [0, 0, 1, 1], [], []>} : vector<8x32xf32>, vector<32x32xf32>, vector<8x32xf32> -> vector<8x32xf32>
    %c2_101 = arith.constant 2 : index
    %c0_102 = arith.constant 0 : index
    %c0_103 = arith.constant 0 : index
    %114 = vector.load %arg5[%c2_101, %c0_102, %c0_103] : memref<26x1x32xf32, #tpu.memory_space<vmem>>, vector<1x1x32xf32>
    %115 = vector.shape_cast %114 : vector<1x1x32xf32> to vector<1x32xf32>
    %116 = vector.broadcast %115 : vector<1x32xf32> to vector<8x32xf32>
    %117 = arith.addf %113, %116 : vector<8x32xf32>
    %118 = arith.addf %103, %19 : vector<8x32xf32>
    %119 = arith.negf %118 : vector<8x32xf32>
    %120 = math.exp %119 : vector<8x32xf32>
    %cst_104 = arith.constant 1.000000e+00 : f32
    %121 = vector.broadcast %cst_104 : f32 to vector<8x32xf32>
    %122 = arith.addf %121, %120 : vector<8x32xf32>
    %123 = arith.divf %121, %122 : vector<8x32xf32>
    %124 = arith.addf %110, %26 : vector<8x32xf32>
    %125 = arith.negf %124 : vector<8x32xf32>
    %126 = math.exp %125 : vector<8x32xf32>
    %cst_105 = arith.constant 1.000000e+00 : f32
    %127 = vector.broadcast %cst_105 : f32 to vector<8x32xf32>
    %128 = arith.addf %127, %126 : vector<8x32xf32>
    %129 = arith.divf %127, %128 : vector<8x32xf32>
    %130 = arith.mulf %123, %33 : vector<8x32xf32>
    %131 = arith.addf %117, %130 : vector<8x32xf32>
    %132 = math.tanh %131 : vector<8x32xf32>
    %cst_106 = arith.constant 1.000000e+00 : f32
    %133 = vector.broadcast %cst_106 : f32 to vector<8x32xf32>
    %134 = arith.subf %133, %129 : vector<8x32xf32>
    %135 = arith.mulf %134, %132 : vector<8x32xf32>
    %136 = arith.mulf %129, %6 : vector<8x32xf32>
    %137 = arith.addf %135, %136 : vector<8x32xf32>
    %c0_107 = arith.constant 0 : index
    %c0_108 = arith.constant 0 : index
    %c0_109 = arith.constant 0 : index
    %138 = vector.load %arg7[%c0_107, %c0_108, %c0_109] : memref<4x8x32xf32, #tpu.memory_space<vmem>>, vector<1x8x32xf32>
    %139 = vector.shape_cast %138 : vector<1x8x32xf32> to vector<8x32xf32>
    %140 = vector.shape_cast %137 : vector<8x32xf32> to vector<1x8x32xf32>
    tpu.vector_store %arg7[%c0_107, %c0_108, %c0_109], %140 {strides = array<i32>} : memref<4x8x32xf32, #tpu.memory_space<vmem>>, vector<1x8x32xf32>,
    %c3_110 = arith.constant 3 : index
    %c0_111 = arith.constant 0 : index
    %c0_112 = arith.constant 0 : index
    %141 = vector.load %arg4[%c3_110, %c0_111, %c0_112] : memref<26x32x32xf32, #tpu.memory_space<vmem>>, vector<1x32x32xf32>
    %142 = vector.shape_cast %141 : vector<1x32x32xf32> to vector<32x32xf32>
    %cst_113 = arith.constant dense<0.000000e+00> : vector<8x32xf32>
    %143 = tpu.matmul %137, %142, %cst_113 {dimension_numbers = #tpu.dot_dimension_numbers<[1], [0], [0], [1], [0, 0, 1, 1], [], []>} : vector<8x32xf32>, vector<32x32xf32>, vector<8x32xf32> -> vector<8x32xf32>
    %c3_114 = arith.constant 3 : index
    %c0_115 = arith.constant 0 : index
    %c0_116 = arith.constant 0 : index
    %144 = vector.load %arg5[%c3_114, %c0_115, %c0_116] : memref<26x1x32xf32, #tpu.memory_space<vmem>>, vector<1x1x32xf32>
    %145 = vector.shape_cast %144 : vector<1x1x32xf32> to vector<1x32xf32>
    %146 = vector.broadcast %145 : vector<1x32xf32> to vector<8x32xf32>
    %147 = arith.addf %143, %146 : vector<8x32xf32>
    %c4 = arith.constant 4 : index
    %c0_117 = arith.constant 0 : index
    %c0_118 = arith.constant 0 : index
    %148 = vector.load %arg4[%c4, %c0_117, %c0_118] : memref<26x32x32xf32, #tpu.memory_space<vmem>>, vector<1x32x32xf32>
    %149 = vector.shape_cast %148 : vector<1x32x32xf32> to vector<32x32xf32>
    %cst_119 = arith.constant dense<0.000000e+00> : vector<8x32xf32>
    %150 = tpu.matmul %137, %149, %cst_119 {dimension_numbers = #tpu.dot_dimension_numbers<[1], [0], [0], [1], [0, 0, 1, 1], [], []>} : vector<8x32xf32>, vector<32x32xf32>, vector<8x32xf32> -> vector<8x32xf32>
    %c4_120 = arith.constant 4 : index
    %c0_121 = arith.constant 0 : index
    %c0_122 = arith.constant 0 : index
    %151 = vector.load %arg5[%c4_120, %c0_121, %c0_122] : memref<26x1x32xf32, #tpu.memory_space<vmem>>, vector<1x1x32xf32>
    %152 = vector.shape_cast %151 : vector<1x1x32xf32> to vector<1x32xf32>
    %153 = vector.broadcast %152 : vector<1x32xf32> to vector<8x32xf32>
    %154 = arith.addf %150, %153 : vector<8x32xf32>
    %c5 = arith.constant 5 : index
    %c0_123 = arith.constant 0 : index
    %c0_124 = arith.constant 0 : index
    %155 = vector.load %arg4[%c5, %c0_123, %c0_124] : memref<26x32x32xf32, #tpu.memory_space<vmem>>, vector<1x32x32xf32>
    %156 = vector.shape_cast %155 : vector<1x32x32xf32> to vector<32x32xf32>
    %cst_125 = arith.constant dense<0.000000e+00> : vector<8x32xf32>
    %157 = tpu.matmul %137, %156, %cst_125 {dimension_numbers = #tpu.dot_dimension_numbers<[1], [0], [0], [1], [0, 0, 1, 1], [], []>} : vector<8x32xf32>, vector<32x32xf32>, vector<8x32xf32> -> vector<8x32xf32>
    %c5_126 = arith.constant 5 : index
    %c0_127 = arith.constant 0 : index
    %c0_128 = arith.constant 0 : index
    %158 = vector.load %arg5[%c5_126, %c0_127, %c0_128] : memref<26x1x32xf32, #tpu.memory_space<vmem>>, vector<1x1x32xf32>
    %159 = vector.shape_cast %158 : vector<1x1x32xf32> to vector<1x32xf32>
    %160 = vector.broadcast %159 : vector<1x32xf32> to vector<8x32xf32>
    %161 = arith.addf %157, %160 : vector<8x32xf32>
    %162 = arith.addf %147, %40 : vector<8x32xf32>
    %163 = arith.negf %162 : vector<8x32xf32>
    %164 = math.exp %163 : vector<8x32xf32>
    %cst_129 = arith.constant 1.000000e+00 : f32
    %165 = vector.broadcast %cst_129 : f32 to vector<8x32xf32>
    %166 = arith.addf %165, %164 : vector<8x32xf32>
    %167 = arith.divf %165, %166 : vector<8x32xf32>
    %168 = arith.addf %154, %47 : vector<8x32xf32>
    %169 = arith.negf %168 : vector<8x32xf32>
    %170 = math.exp %169 : vector<8x32xf32>
    %cst_130 = arith.constant 1.000000e+00 : f32
    %171 = vector.broadcast %cst_130 : f32 to vector<8x32xf32>
    %172 = arith.addf %171, %170 : vector<8x32xf32>
    %173 = arith.divf %171, %172 : vector<8x32xf32>
    %174 = arith.mulf %167, %54 : vector<8x32xf32>
    %175 = arith.addf %161, %174 : vector<8x32xf32>
    %176 = math.tanh %175 : vector<8x32xf32>
    %cst_131 = arith.constant 1.000000e+00 : f32
    %177 = vector.broadcast %cst_131 : f32 to vector<8x32xf32>
    %178 = arith.subf %177, %173 : vector<8x32xf32>
    %179 = arith.mulf %178, %176 : vector<8x32xf32>
    %180 = arith.mulf %173, %8 : vector<8x32xf32>
    %181 = arith.addf %179, %180 : vector<8x32xf32>
    %c1_132 = arith.constant 1 : index
    %c0_133 = arith.constant 0 : index
    %c0_134 = arith.constant 0 : index
    %182 = vector.load %arg7[%c1_132, %c0_133, %c0_134] : memref<4x8x32xf32, #tpu.memory_space<vmem>>, vector<1x8x32xf32>
    %183 = vector.shape_cast %182 : vector<1x8x32xf32> to vector<8x32xf32>
    %184 = vector.shape_cast %181 : vector<8x32xf32> to vector<1x8x32xf32>
    tpu.vector_store %arg7[%c1_132, %c0_133, %c0_134], %184 {strides = array<i32>} : memref<4x8x32xf32, #tpu.memory_space<vmem>>, vector<1x8x32xf32>,
    %c6 = arith.constant 6 : index
    %c0_135 = arith.constant 0 : index
    %c0_136 = arith.constant 0 : index
    %185 = vector.load %arg4[%c6, %c0_135, %c0_136] : memref<26x32x32xf32, #tpu.memory_space<vmem>>, vector<1x32x32xf32>
    %186 = vector.shape_cast %185 : vector<1x32x32xf32> to vector<32x32xf32>
    %cst_137 = arith.constant dense<0.000000e+00> : vector<8x32xf32>
    %187 = tpu.matmul %181, %186, %cst_137 {dimension_numbers = #tpu.dot_dimension_numbers<[1], [0], [0], [1], [0, 0, 1, 1], [], []>} : vector<8x32xf32>, vector<32x32xf32>, vector<8x32xf32> -> vector<8x32xf32>
    %c6_138 = arith.constant 6 : index
    %c0_139 = arith.constant 0 : index
    %c0_140 = arith.constant 0 : index
    %188 = vector.load %arg5[%c6_138, %c0_139, %c0_140] : memref<26x1x32xf32, #tpu.memory_space<vmem>>, vector<1x1x32xf32>
    %189 = vector.shape_cast %188 : vector<1x1x32xf32> to vector<1x32xf32>
    %190 = vector.broadcast %189 : vector<1x32xf32> to vector<8x32xf32>
    %191 = arith.addf %187, %190 : vector<8x32xf32>
    %c7 = arith.constant 7 : index
    %c0_141 = arith.constant 0 : index
    %c0_142 = arith.constant 0 : index
    %192 = vector.load %arg4[%c7, %c0_141, %c0_142] : memref<26x32x32xf32, #tpu.memory_space<vmem>>, vector<1x32x32xf32>
    %193 = vector.shape_cast %192 : vector<1x32x32xf32> to vector<32x32xf32>
    %cst_143 = arith.constant dense<0.000000e+00> : vector<8x32xf32>
    %194 = tpu.matmul %181, %193, %cst_143 {dimension_numbers = #tpu.dot_dimension_numbers<[1], [0], [0], [1], [0, 0, 1, 1], [], []>} : vector<8x32xf32>, vector<32x32xf32>, vector<8x32xf32> -> vector<8x32xf32>
    %c7_144 = arith.constant 7 : index
    %c0_145 = arith.constant 0 : index
    %c0_146 = arith.constant 0 : index
    %195 = vector.load %arg5[%c7_144, %c0_145, %c0_146] : memref<26x1x32xf32, #tpu.memory_space<vmem>>, vector<1x1x32xf32>
    %196 = vector.shape_cast %195 : vector<1x1x32xf32> to vector<1x32xf32>
    %197 = vector.broadcast %196 : vector<1x32xf32> to vector<8x32xf32>
    %198 = arith.addf %194, %197 : vector<8x32xf32>
    %c8 = arith.constant 8 : index
    %c0_147 = arith.constant 0 : index
    %c0_148 = arith.constant 0 : index
    %199 = vector.load %arg4[%c8, %c0_147, %c0_148] : memref<26x32x32xf32, #tpu.memory_space<vmem>>, vector<1x32x32xf32>
    %200 = vector.shape_cast %199 : vector<1x32x32xf32> to vector<32x32xf32>
    %cst_149 = arith.constant dense<0.000000e+00> : vector<8x32xf32>
    %201 = tpu.matmul %181, %200, %cst_149 {dimension_numbers = #tpu.dot_dimension_numbers<[1], [0], [0], [1], [0, 0, 1, 1], [], []>} : vector<8x32xf32>, vector<32x32xf32>, vector<8x32xf32> -> vector<8x32xf32>
    %c8_150 = arith.constant 8 : index
    %c0_151 = arith.constant 0 : index
    %c0_152 = arith.constant 0 : index
    %202 = vector.load %arg5[%c8_150, %c0_151, %c0_152] : memref<26x1x32xf32, #tpu.memory_space<vmem>>, vector<1x1x32xf32>
    %203 = vector.shape_cast %202 : vector<1x1x32xf32> to vector<1x32xf32>
    %204 = vector.broadcast %203 : vector<1x32xf32> to vector<8x32xf32>
    %205 = arith.addf %201, %204 : vector<8x32xf32>
    %206 = arith.addf %191, %61 : vector<8x32xf32>
    %207 = arith.negf %206 : vector<8x32xf32>
    %208 = math.exp %207 : vector<8x32xf32>
    %cst_153 = arith.constant 1.000000e+00 : f32
    %209 = vector.broadcast %cst_153 : f32 to vector<8x32xf32>
    %210 = arith.addf %209, %208 : vector<8x32xf32>
    %211 = arith.divf %209, %210 : vector<8x32xf32>
    %212 = arith.addf %198, %68 : vector<8x32xf32>
    %213 = arith.negf %212 : vector<8x32xf32>
    %214 = math.exp %213 : vector<8x32xf32>
    %cst_154 = arith.constant 1.000000e+00 : f32
    %215 = vector.broadcast %cst_154 : f32 to vector<8x32xf32>
    %216 = arith.addf %215, %214 : vector<8x32xf32>
    %217 = arith.divf %215, %216 : vector<8x32xf32>
    %218 = arith.mulf %211, %75 : vector<8x32xf32>
    %219 = arith.addf %205, %218 : vector<8x32xf32>
    %220 = math.tanh %219 : vector<8x32xf32>
    %cst_155 = arith.constant 1.000000e+00 : f32
    %221 = vector.broadcast %cst_155 : f32 to vector<8x32xf32>
    %222 = arith.subf %221, %217 : vector<8x32xf32>
    %223 = arith.mulf %222, %220 : vector<8x32xf32>
    %224 = arith.mulf %217, %10 : vector<8x32xf32>
    %225 = arith.addf %223, %224 : vector<8x32xf32>
    %c2_156 = arith.constant 2 : index
    %c0_157 = arith.constant 0 : index
    %c0_158 = arith.constant 0 : index
    %226 = vector.load %arg7[%c2_156, %c0_157, %c0_158] : memref<4x8x32xf32, #tpu.memory_space<vmem>>, vector<1x8x32xf32>
    %227 = vector.shape_cast %226 : vector<1x8x32xf32> to vector<8x32xf32>
    %228 = vector.shape_cast %225 : vector<8x32xf32> to vector<1x8x32xf32>
    tpu.vector_store %arg7[%c2_156, %c0_157, %c0_158], %228 {strides = array<i32>} : memref<4x8x32xf32, #tpu.memory_space<vmem>>, vector<1x8x32xf32>,
    %c9 = arith.constant 9 : index
    %c0_159 = arith.constant 0 : index
    %c0_160 = arith.constant 0 : index
    %229 = vector.load %arg4[%c9, %c0_159, %c0_160] : memref<26x32x32xf32, #tpu.memory_space<vmem>>, vector<1x32x32xf32>
    %230 = vector.shape_cast %229 : vector<1x32x32xf32> to vector<32x32xf32>
    %cst_161 = arith.constant dense<0.000000e+00> : vector<8x32xf32>
    %231 = tpu.matmul %225, %230, %cst_161 {dimension_numbers = #tpu.dot_dimension_numbers<[1], [0], [0], [1], [0, 0, 1, 1], [], []>} : vector<8x32xf32>, vector<32x32xf32>, vector<8x32xf32> -> vector<8x32xf32>
    %c9_162 = arith.constant 9 : index
    %c0_163 = arith.constant 0 : index
    %c0_164 = arith.constant 0 : index
    %232 = vector.load %arg5[%c9_162, %c0_163, %c0_164] : memref<26x1x32xf32, #tpu.memory_space<vmem>>, vector<1x1x32xf32>
    %233 = vector.shape_cast %232 : vector<1x1x32xf32> to vector<1x32xf32>
    %234 = vector.broadcast %233 : vector<1x32xf32> to vector<8x32xf32>
    %235 = arith.addf %231, %234 : vector<8x32xf32>
    %c10 = arith.constant 10 : index
    %c0_165 = arith.constant 0 : index
    %c0_166 = arith.constant 0 : index
    %236 = vector.load %arg4[%c10, %c0_165, %c0_166] : memref<26x32x32xf32, #tpu.memory_space<vmem>>, vector<1x32x32xf32>
    %237 = vector.shape_cast %236 : vector<1x32x32xf32> to vector<32x32xf32>
    %cst_167 = arith.constant dense<0.000000e+00> : vector<8x32xf32>
    %238 = tpu.matmul %225, %237, %cst_167 {dimension_numbers = #tpu.dot_dimension_numbers<[1], [0], [0], [1], [0, 0, 1, 1], [], []>} : vector<8x32xf32>, vector<32x32xf32>, vector<8x32xf32> -> vector<8x32xf32>
    %c10_168 = arith.constant 10 : index
    %c0_169 = arith.constant 0 : index
    %c0_170 = arith.constant 0 : index
    %239 = vector.load %arg5[%c10_168, %c0_169, %c0_170] : memref<26x1x32xf32, #tpu.memory_space<vmem>>, vector<1x1x32xf32>
    %240 = vector.shape_cast %239 : vector<1x1x32xf32> to vector<1x32xf32>
    %241 = vector.broadcast %240 : vector<1x32xf32> to vector<8x32xf32>
    %242 = arith.addf %238, %241 : vector<8x32xf32>
    %c11 = arith.constant 11 : index
    %c0_171 = arith.constant 0 : index
    %c0_172 = arith.constant 0 : index
    %243 = vector.load %arg4[%c11, %c0_171, %c0_172] : memref<26x32x32xf32, #tpu.memory_space<vmem>>, vector<1x32x32xf32>
    %244 = vector.shape_cast %243 : vector<1x32x32xf32> to vector<32x32xf32>
    %cst_173 = arith.constant dense<0.000000e+00> : vector<8x32xf32>
    %245 = tpu.matmul %225, %244, %cst_173 {dimension_numbers = #tpu.dot_dimension_numbers<[1], [0], [0], [1], [0, 0, 1, 1], [], []>} : vector<8x32xf32>, vector<32x32xf32>, vector<8x32xf32> -> vector<8x32xf32>
    %c11_174 = arith.constant 11 : index
    %c0_175 = arith.constant 0 : index
    %c0_176 = arith.constant 0 : index
    %246 = vector.load %arg5[%c11_174, %c0_175, %c0_176] : memref<26x1x32xf32, #tpu.memory_space<vmem>>, vector<1x1x32xf32>
    %247 = vector.shape_cast %246 : vector<1x1x32xf32> to vector<1x32xf32>
    %248 = vector.broadcast %247 : vector<1x32xf32> to vector<8x32xf32>
    %249 = arith.addf %245, %248 : vector<8x32xf32>
    %250 = arith.addf %235, %82 : vector<8x32xf32>
    %251 = arith.negf %250 : vector<8x32xf32>
    %252 = math.exp %251 : vector<8x32xf32>
    %cst_177 = arith.constant 1.000000e+00 : f32
    %253 = vector.broadcast %cst_177 : f32 to vector<8x32xf32>
    %254 = arith.addf %253, %252 : vector<8x32xf32>
    %255 = arith.divf %253, %254 : vector<8x32xf32>
    %256 = arith.addf %242, %89 : vector<8x32xf32>
    %257 = arith.negf %256 : vector<8x32xf32>
    %258 = math.exp %257 : vector<8x32xf32>
    %cst_178 = arith.constant 1.000000e+00 : f32
    %259 = vector.broadcast %cst_178 : f32 to vector<8x32xf32>
    %260 = arith.addf %259, %258 : vector<8x32xf32>
    %261 = arith.divf %259, %260 : vector<8x32xf32>
    %262 = arith.mulf %255, %96 : vector<8x32xf32>
    %263 = arith.addf %249, %262 : vector<8x32xf32>
    %264 = math.tanh %263 : vector<8x32xf32>
    %cst_179 = arith.constant 1.000000e+00 : f32
    %265 = vector.broadcast %cst_179 : f32 to vector<8x32xf32>
    %266 = arith.subf %265, %261 : vector<8x32xf32>
    %267 = arith.mulf %266, %264 : vector<8x32xf32>
    %268 = arith.mulf %261, %12 : vector<8x32xf32>
    %269 = arith.addf %267, %268 : vector<8x32xf32>
    %c3_180 = arith.constant 3 : index
    %c0_181 = arith.constant 0 : index
    %c0_182 = arith.constant 0 : index
    %270 = vector.load %arg7[%c3_180, %c0_181, %c0_182] : memref<4x8x32xf32, #tpu.memory_space<vmem>>, vector<1x8x32xf32>
    %271 = vector.shape_cast %270 : vector<1x8x32xf32> to vector<8x32xf32>
    %272 = vector.shape_cast %269 : vector<8x32xf32> to vector<1x8x32xf32>
    tpu.vector_store %arg7[%c3_180, %c0_181, %c0_182], %272 {strides = array<i32>} : memref<4x8x32xf32, #tpu.memory_space<vmem>>, vector<1x8x32xf32>,
    %c24 = arith.constant 24 : index
    %c0_183 = arith.constant 0 : index
    %c0_184 = arith.constant 0 : index
    %273 = vector.load %arg4[%c24, %c0_183, %c0_184] : memref<26x32x32xf32, #tpu.memory_space<vmem>>, vector<1x32x32xf32>
    %274 = vector.shape_cast %273 : vector<1x32x32xf32> to vector<32x32xf32>
    %cst_185 = arith.constant dense<0.000000e+00> : vector<8x32xf32>
    %275 = tpu.matmul %269, %274, %cst_185 {dimension_numbers = #tpu.dot_dimension_numbers<[1], [0], [0], [1], [0, 0, 1, 1], [], []>} : vector<8x32xf32>, vector<32x32xf32>, vector<8x32xf32> -> vector<8x32xf32>
    %c24_186 = arith.constant 24 : index
    %c0_187 = arith.constant 0 : index
    %c0_188 = arith.constant 0 : index
    %276 = vector.load %arg5[%c24_186, %c0_187, %c0_188] : memref<26x1x32xf32, #tpu.memory_space<vmem>>, vector<1x1x32xf32>
    %277 = vector.shape_cast %276 : vector<1x1x32xf32> to vector<1x32xf32>
    %278 = vector.broadcast %277 : vector<1x32xf32> to vector<8x32xf32>
    %279 = arith.addf %275, %278 : vector<8x32xf32>
    %cst_189 = arith.constant 0.000000e+00 : f32
    %280 = vector.broadcast %cst_189 : f32 to vector<8x32xf32>
    %281 = arith.cmpf ogt, %279, %280 : vector<8x32xf32>
    %cst_190 = arith.constant 0.00999999977 : f32
    %282 = vector.broadcast %cst_190 : f32 to vector<8x32xf32>
    %283 = arith.mulf %282, %279 : vector<8x32xf32>
    %284 = arith.select %281, %279, %283 : vector<8x32xi1>, vector<8x32xf32>
    %c25 = arith.constant 25 : index
    %c0_191 = arith.constant 0 : index
    %c0_192 = arith.constant 0 : index
    %285 = vector.load %arg4[%c25, %c0_191, %c0_192] : memref<26x32x32xf32, #tpu.memory_space<vmem>>, vector<1x32x32xf32>
    %286 = vector.shape_cast %285 : vector<1x32x32xf32> to vector<32x32xf32>
    %cst_193 = arith.constant dense<0.000000e+00> : vector<8x32xf32>
    %287 = tpu.matmul %284, %286, %cst_193 {dimension_numbers = #tpu.dot_dimension_numbers<[1], [0], [0], [1], [0, 0, 1, 1], [], []>} : vector<8x32xf32>, vector<32x32xf32>, vector<8x32xf32> -> vector<8x32xf32>
    %c25_194 = arith.constant 25 : index
    %c0_195 = arith.constant 0 : index
    %c0_196 = arith.constant 0 : index
    %288 = vector.load %arg5[%c25_194, %c0_195, %c0_196] : memref<26x1x32xf32, #tpu.memory_space<vmem>>, vector<1x1x32xf32>
    %289 = vector.shape_cast %288 : vector<1x1x32xf32> to vector<1x32xf32>
    %290 = vector.broadcast %289 : vector<1x32xf32> to vector<8x32xf32>
    %291 = arith.addf %287, %290 : vector<8x32xf32>
    %c0_197 = arith.constant 0 : index
    %c0_198 = arith.constant 0 : index
    %c0_199 = arith.constant 0 : index
    %292 = vector.load %arg6[%c0_197, %c0_198, %c0_199] : memref<1x8x32xf32, #tpu.memory_space<vmem>>, vector<1x8x32xf32>
    %293 = vector.shape_cast %292 : vector<1x8x32xf32> to vector<8x32xf32>
    %294 = vector.shape_cast %291 : vector<8x32xf32> to vector<1x8x32xf32>
    tpu.vector_store %arg6[%c0_197, %c0_198, %c0_199], %294 {strides = array<i32>} : memref<1x8x32xf32, #tpu.memory_space<vmem>>, vector<1x8x32xf32>,
    return
  }
  func.func @transform_0(%arg0: i32, %arg1: i32) -> (i32, i32, i32) {
    %c0_i32 = arith.constant 0 : i32
    %c0_i32_0 = arith.constant 0 : i32
    return %arg1, %arg0, %c0_i32 : i32, i32, i32
  }
  func.func @transform_1(%arg0: i32, %arg1: i32) -> (i32, i32, i32) {
    %c0_i32 = arith.constant 0 : i32
    %c0_i32_0 = arith.constant 0 : i32
    %c0_i32_1 = arith.constant 0 : i32
    return %c0_i32, %arg0, %c0_i32_0 : i32, i32, i32
  }
  func.func @transform_2(%arg0: i32, %arg1: i32) -> (i32, i32, i32) {
    %c0_i32 = arith.constant 0 : i32
    %c0_i32_0 = arith.constant 0 : i32
    %c0_i32_1 = arith.constant 0 : i32
    %c0_i32_2 = arith.constant 0 : i32
    return %c0_i32, %c0_i32_0, %c0_i32_1 : i32, i32, i32
  }
  func.func @transform_3(%arg0: i32, %arg1: i32) -> (i32, i32, i32) {
    %c0_i32 = arith.constant 0 : i32
    %c0_i32_0 = arith.constant 0 : i32
    %c0_i32_1 = arith.constant 0 : i32
    %c0_i32_2 = arith.constant 0 : i32
    return %c0_i32, %c0_i32_0, %c0_i32_1 : i32, i32, i32
  }
  func.func @transform_4(%arg0: i32, %arg1: i32) -> (i32, i32, i32) {
    %c0_i32 = arith.constant 0 : i32
    %c0_i32_0 = arith.constant 0 : i32
    return %arg1, %arg0, %c0_i32 : i32, i32, i32
  }
  func.func @transform_5(%arg0: i32, %arg1: i32) -> (i32, i32, i32) {
    %c0_i32 = arith.constant 0 : i32
    %c0_i32_0 = arith.constant 0 : i32
    %c0_i32_1 = arith.constant 0 : i32
    return %c0_i32, %arg0, %c0_i32_0 : i32, i32, i32
  }
}

</mosaic_0001>

<bundles_post_ra>
// kernel: tpu_custom_call.1
= control target key start
LH: loop header
LB: loop body
LE: loop exit
PB: predicated region body
PF: predicated region fallthrough
CT: control target
= control target key end

     0   :  { %s4447_s0 = inlined_call_operand.hbm [shape: f32[8,16,32], index: 0, kind: input, shape index: {}]   ;;  %s4448_s1 = inlined_call_operand.hbm [shape: f32[4,16,32], index: 1, kind: input, shape index: {}]   ;;  %s4449_s2 = inlined_call_operand.hbm [shape: f32[26,32,32], index: 2, kind: input, shape index: {}]   ;;  %s4450_s3 = inlined_call_operand.hbm [shape: f32[26,1,32], index: 3, kind: input, shape index: {}]   ;;  %s4451_s4 = inlined_call_operand.hbm [shape: f32[8,16,32], index: 4, kind: output, shape index: {0}]   ;;  %s4452_s5 = inlined_call_operand.hbm [shape: f32[4,16,32], index: 5, kind: output, shape index: {1}]  }
   0x1   :  { %4472 = sst [smem:[#allocation30_spill]] %s4447_s0 }
   0x2   :  { %4473 = sst [smem:[#allocation31_spill]] %s4449_s2 }
   0x3   :  { %4474 = sst [smem:[#allocation32_spill]] %s4450_s3 }
   0x4   :  { %4475 = sst [smem:[#allocation33_spill]] %s4451_s4 }
   0x5   :  { %4476 = sst [smem:[#allocation34_spill]] %s4452_s5 }
   0x6   :  { %11 = vsyncpa [#allocation3], 0 }
   0x7   :  { %13 = vsyncpa [#allocation3 + $0x1], 0 }
   0x8   :  { %14 = vsyncpa [#allocation6], 0 }
   0x9   :  { %16 = vsyncpa [#allocation6 + $0x1], 0 }
   0xa   :  { %17 = vsyncpa [#allocation9], 0 }
   0xb   :  { %18 = vsyncpa [#allocation4], 0 }
   0xc   :  { %20 = vsyncpa [#allocation4 + $0x1], 0 }
   0xd   :  { %21 = vsyncpa [#allocation12], 0 }
   0xe   :  { %23 = vsyncpa [#allocation12 + $0x1], 0  ;;  %s3841_s18 = smov 0   ;;  %s3843_s19 = smov 0  }
   0xf   :  { %s3845_s20 = smov 0   ;;  %s3847_s21 = smov 0  }
  0x10   :  { %s3849_s22 = smov 0   ;;  %s3851_s23 = smov 0  }
  0x11   :  { %s3853_s24 = smov 0   ;;  %s3855_s25 = smov 0  }
  0x12   :  { %s3857_s26 = smov 0   ;;  %s3859_s27 = smov 0  }
  0x13   :  { %s3861_s28 = smov 0  }
  0x14 LB: > { %4477 = sst [smem:[#allocation19_spill]] %s3753_s18  ;;  %s3897_s29 = sadd.s32 4294967295, %s3793_s28   ;;  %s3793_s28 = sphi %s3861_s28, %s29_s28   ;;  %s3789_s27 = sphi %s3859_s27, %s4533_s27   ;;  %s3785_s26 = sphi %s3857_s26, %s4526_s26   ;;  %s3781_s25 = sphi %s3855_s25, %s4532_s25   ;;  %s3777_s24 = sphi %s3853_s24, %s4525_s24   ;;  %s3773_s23 = sphi %s3851_s23, %s4524_s23   ;;  %s3769_s22 = sphi %s3849_s22, %s4531_s22   ;;  %s3765_s21 = sphi %s3847_s21, %s4530_s21   ;;  %s3761_s20 = sphi %s3845_s20, %s4522_s20   ;;  %s3757_s19 = sphi %s3843_s19, %s4529_s19   ;;  %s3753_s18 = sphi %s3841_s18, %s4528_s18  }
  0x15   : > { %4478 = sst [smem:[#allocation20_spill]] %s3761_s20  ;;  %p4457_p0 = scmp.ne.s32.totalorder %s3757_s19, %s3753_s18 }
  0x16   : > { %4479 = sst [smem:[#allocation21_spill]] %s3765_s21  ;;  %p4455_p1 = scmp.eq.s32.totalorder %s3897_s29, 0 }
  0x17   : > { %4480 = sst [smem:[#allocation22_spill]] %s3773_s23  ;;  %p2834_p2 = scmp.ge.s32.totalorder %s3793_s28, 1 }
  0x18   : > { %4481 = sst [smem:[#allocation23_spill]] %s3785_s26  ;;  %p196_p3 = scmp.lt.s32.totalorder %s3793_s28, 17 }
  0x19   : > { %p3909_p4 = por %p4457_p0, %p4455_p1  ;;  %s3795_s7 = smov [#allocation7]  }
  0x1a   : > { %p3913_p5 = pnand %p2834_p2, %p196_p3  ;;  %s208_s8 = sshll.u32 %s3795_s7, 4  ;;  %s209_s8 = int_to_ptr.vmem [resolvable:$true] %s208_s8 }
  0x1b   : > { %s4482_s30 = scalar_select %p3909_p4, 1, 0 }
  0x1c   : > { %p3356_p6 = pneg %p3913_p5  ;;  %s3796_s10 = smov [#allocation8]  }
  0x1d   : > { %s221_s11 = sshll.u32 %s3796_s10, 4  ;;  %s3534_s12 = scalar_lea.vmem %s209_s8, 13312  ;;  %s222_s11 = int_to_ptr.vmem [resolvable:$true] %s221_s11 }
  0x1e   : > { %p3921_p7 = pnand %p3356_p6, %p4455_p1  ;;  %p3535_p9 = scmp.ne.s32.totalorder %s209_s8, %s3534_s12 }
  0x1f   : > { %p3542_p12 = scmp.lt.s32.totalorder %s209_s8, %s209_s8  ;;  %p3543_p13 = scmp.lt.s32.totalorder %s3534_s12, %s3534_s12 }
  0x20   : > { %p3525_p8 = pneg %p3921_p7 }
  0x21   : > { %p3544_p2 = por %p3543_p13, %p3542_p12 }
  0x22   : > { %p3537_p10 = pnand %p3535_p9, %p3525_p8 }
  0x24   : > { %p3538_p11 = pneg %p3537_p10 }
  0x26   : > { %p3545_p3 = pnand %p3544_p2, %p3538_p11 }
  0x28   : > { %3548 = shalt.err (!%p3545_p3)
}
  0x29   : > { %s4453_s13 = smov 128   ;;  %s4454_s14 = smov 8  }
  0x2a   : > { %s4485_s2 = sld [smem:[#allocation31_spill]]  ;;  %s3560_s17 = scalar_lea.vmem %s222_s11, 416 }
  0x2b   : > { %p3561_p6 = scmp.ne.s32.totalorder %s222_s11, %s3560_s17  ;;  %p3568_p11 = scmp.lt.s32.totalorder %s222_s11, %s222_s11 }
  0x2c   : > { %p3569_p12 = scmp.lt.s32.totalorder %s3560_s17, %s3560_s17 }
  0x2d   : > { %p3563_p9 = pnand %p3561_p6, %p3525_p8 }
  0x2e   : > { %p3570_p13 = por %p3569_p12, %p3568_p11 }
  0x2f   : > { %p3564_p10 = pneg %p3563_p9 }
  0x30   : > { %3359 = dma.hbm_to_vmem [thread:$0]  (!%p3921_p7), %s4485_s2, 13312, %s209_s8, [#allocation6], %s4453_s13, %s4453_s13, %s4454_s14  }
  0x31   : > { %p3571_p2 = pnand %p3570_p13, %p3564_p10 }
  0x33   : > { %3574 = shalt.err (!%p3571_p2)
}
  0x34   : > { %s3799_s7 = smov 16   ;;  %s3800_s8 = smov 1  }
  0x35   : > { %s4486_s3 = sld [smem:[#allocation32_spill]]  ;;  %s2833_s15 = sadd.s32 4294967294, %s3793_s28  }
  0x36   : > { %s38_s16 = sadd.s32 1, %s3785_s26  ;;  %s41_s17 = sadd.s32 1, %s3789_s27 }
  0x37   : > { %p39_p8 = scmp.ge.s32.totalorder %s38_s16, 8  ;;  %s50_s13 = sadd.s32 1, %s3773_s23 }
  0x38   : > { %p57_p3 = scmp.ne.s32.totalorder %s3773_s23, %s3769_s22  ;;  %p4458_p9 = scmp.ne.s32.totalorder %s3769_s22, %s3765_s21 }
  0x39   : > { %s4535_s16 = smov (%p39_p8, %s38_s16), 0  ;;  %s4537_s17 = smov (!%p39_p8, %s41_s17), %s3789_s27 }
  0x3a   : > { %4487 = sst [smem:[#allocation24_spill]] %s4535_s16  ;;  %s45_s9 = ssub.s32 %s3785_s26, %s4535_s16 }
  0x3b   : > { %3362 = dma.hbm_to_vmem [thread:$0]  (!%p3921_p7), %s4486_s3, 416, %s222_s11, [#allocation9], %s3799_s7, %s3799_s7, %s3800_s8  }
  0x3c   : > { %p58_p7 = scmp.eq.s32.totalorder %s3793_s28, 0  ;;  %p43_p6 = scmp.ge.s32.totalorder %s4537_s17, 2 }
  0x3d   : > { %s76_s7 = sadd.s32 1, %s3761_s20  ;;  %p3977_p11 = por %p4455_p1, %p4458_p9 }
  0x3e   : > { %p3965_p10 = por %p58_p7, %p57_p3  ;;  %s4539_s17 = smov (%p43_p6, %s4537_s17), 0 }
  0x3f   : > { %4489 = sst [smem:[#allocation25_spill]] %s4539_s17  ;;  %p83_p12 = scmp.ne.s32.totalorder %s3761_s20, %s3757_s19 }
  0x40   : > { %s46_s10 = ssub.s32 %s3789_s27, %s4539_s17  ;;  %p157_p13 = scmp.eq.s32.totalorder %s3897_s29, 15 }
  0x41   : > { %s47_s12 = sor.u32 %s46_s10, %s45_s9  ;;  %p74_p2 = scmp.eq.s32.totalorder %s46_s10, 0 }
  0x42   : > { %p48_p8 = scmp.eq.s32.totalorder %s47_s12, 0  ;;  %p3988_p6 = por %p83_p12, %p58_p7 }
  0x43   : > { %s3993_s2 = scalar_select %p74_p2, %s3761_s20, %s76_s7  }
  0x44   : > { %s3996_s3 = scalar_select %p48_p8, %s3773_s23, %s50_s13  }
  0x45   : > { %4492 = sst [smem:[#allocation26_spill]] %s3993_s2  ;;  %p4001_p1 = por %p157_p13, %p57_p3 }
  0x46   : > { %4493 = sst [smem:[#allocation27_spill]] %s3996_s3  ;;  %p163_p0 = scmp.eq.s32.totalorder %s2833_s15, 15 }
  0x47   : > { %s4494_s16 = scalar_select %p4001_p1, 1, 0 }
  0x48   : > { %p4005_p9 = por %p157_p13, %p83_p12  ;;  %p3379_p7 = scmp.lt.s32.totalorder %s3793_s28, 16 }
  0x49   : > { %4495 = sst [smem:[#allocation28_spill]] %s4494_s16  ;;  %p4497_p2 = scmp.ne.s32.totalorder %s3769_s22, %s3765_s21 }
  0x4a   : > { %p4499_p4 = scmp.ne.s32.totalorder %s3757_s19, %s3753_s18  ;;  %s235_s10 = sand.u32 1, %s3773_s23  }
  0x4b   : > { %p4013_p8 = por %p163_p0, %p4497_p2  ;;  %s2839_s12 = sshll.u32 %s3785_s26, 1 }
  0x4c   : > { %p4020_p3 = por %p163_p0, %p4499_p4  ;;  %s2838_s15 = sshll.u32 %s235_s10, 3 }
  0x4d   : > { %s4498_s13 = scalar_select %p4013_p8, 1, 0 }
  0x4e   : > { %s4500_s7 = scalar_select %p4020_p3, 1, 0 }
  0x4f   : > { %s244_s17 = sadd.s32 %s3789_s27, %s2839_s12  ;;  %s239_s2 = scalar_lea.vmem [#allocation2], %s2838_s15 }
  0x50   : > { %4501 = sst [smem:[#allocation29_spill]] %s4500_s7  ;;  %s2840_s3 = sshll.u32 %s244_s17, 7 }
  0x51   : > { %s248_s4 = sshll.u32 %s239_s2, 4  ;;  %s4502_s0 = sld [smem:[#allocation30_spill]]  ;;  %s249_s4 = int_to_ptr.vmem [resolvable:$true] %s248_s4 }
  0x52   : > { %p4034_p12 = pnand %p3379_p7, %p3965_p10  ;;  %p4042_p0 = pnand %p3379_p7, %p3988_p6 }
  0x53   : > { %s255_s17 = sand.u32 1, %s3793_s28   ;;  %s257_s2 = sand.u32 1, %s3761_s20  }
  0x54   : > { %s236_s12 = scalar_lea.sflag [#allocation3], %s235_s10  ;;  %p3577_p4 = pneg %p4034_p12 }
  0x55   : > { %s3801_s5 = smov [#allocation2]  }
  0x56   : > { %s3593_s16 = sshll.u32 %s3801_s5, 4  ;;  %s3594_s16 = int_to_ptr.vmem [resolvable:$false] %s3593_s16 }
  0x57   : > { %s246_s21 = scalar_lea.hbm %s4502_s0, %s2840_s3  ;;  %s3588_s3 = scalar_lea.vmem %s249_s4, 128 }
  0x58   : > { %p3589_p13 = scmp.ne.s32.totalorder %s249_s4, %s3588_s3  ;;  %s3595_s11 = scalar_lea.vmem %s3594_s16, 256 }
  0x59   : > { %p3596_p10 = scmp.lt.s32.totalorder %s249_s4, %s3594_s16  ;;  %p3597_p8 = scmp.lt.s32.totalorder %s3595_s11, %s3588_s3 }
  0x5a   : > { %p3591_p2 = pnand %p3589_p13, %p3577_p4 }
  0x5b   : > { %p3598_p1 = por %p3597_p8, %p3596_p10 }
  0x5c   : > { %p3592_p3 = pneg %p3591_p2 }
  0x5e   : > { %p3599_p6 = pnand %p3598_p1, %p3592_p3 }
  0x60   : > { %3602 = shalt.err (!%p3599_p6)
}
  0x61   : > { %3366 = dma.hbm_to_vmem [thread:$0]  (!%p4034_p12), %s246_s21, 128, %s249_s4, %s236_s12  }
  0x62   : > { %s2841_s14 = sshll.u32 %s257_s2, 5  ;;  %s2842_s10 = sshll.u32 %s3789_s27, 7 }
  0x63   : > { %s264_s23 = scalar_lea.hbm %s4448_s1, %s2842_s10  ;;  %s259_s20 = scalar_lea.vmem [#allocation5], %s2841_s14 }
  0x64   : > { %s265_s5 = sshll.u32 %s259_s20, 4  ;;  %s256_s7 = scalar_lea.sflag [#allocation6], %s255_s17  ;;  %s266_s5 = int_to_ptr.vmem [resolvable:$true] %s265_s5 }
  0x65   : > { %p3605_p7 = pneg %p4042_p0  ;;  %s3616_s3 = scalar_lea.vmem %s266_s5, 512 }
  0x66   : > { %p3617_p1 = scmp.ne.s32.totalorder %s266_s5, %s3616_s3  ;;  %s3802_s18 = smov [#allocation5]  }
  0x67   : > { %s3621_s16 = sshll.u32 %s3802_s18, 4  ;;  %s3622_s16 = int_to_ptr.vmem [resolvable:$false] %s3621_s16 }
  0x68   : > { %p3619_p8 = pnand %p3617_p1, %p3605_p7  ;;  %s3623_s4 = scalar_lea.vmem %s3622_s16, 1024 }
  0x69   : > { %p3624_p12 = scmp.lt.s32.totalorder %s266_s5, %s3622_s16  ;;  %p3625_p4 = scmp.lt.s32.totalorder %s3623_s4, %s3616_s3 }
  0x6a   : > { %p3620_p3 = pneg %p3619_p8 }
  0x6b   : > { %p3626_p13 = por %p3625_p4, %p3624_p12 }
  0x6d   : > { %p3627_p2 = pnand %p3626_p13, %p3620_p3 }
  0x6f   : > { %3630 = shalt.err (!%p3627_p2)
}
  0x70   : > { %s3803_s0 = smov 256   ;;  %s4505_s20 = smov 8  }
  0x71   : > { %s4506_s21 = smov 128   ;;  %277 = sbr.rel (%p3913_p5) target bundleno = 1621 (0x655), region = 36 }
  0x72   : > { %3369 = dma.hbm_to_vmem [thread:$0]  (!%p4042_p0), %s264_s23, 512, %s266_s5, %s256_s7, %s3803_s0, %s4506_s21, %s4505_s20  }
  0x73   : > { %s4065_s17 = sand.u32 (!%p3913_p5), 1, %s3769_s22  }
  0x74   : > { %s2844_s2 = sshll.u32 (!%p3913_p5), %s4065_s17, 3  ;;  %s280_s12 = scalar_lea.sflag (!%p3913_p5), [#allocation3], %s4065_s17 }
  0x75   : > { %s4069_s11 = scalar_lea.vmem (!%p3913_p5), [#allocation2], %s2844_s2 }
  0x76   : > { %3728 = dma.done.wait (%p3977_p11), %s280_s12, 128  }
  0x77   : > { %3730 = vsyncadd (%p3977_p11), %s280_s12, 4294967168  ;;  %s288_s23 = sand.u32 1, %s3897_s29   ;;  %s290_s26 = sand.u32 1, %s3757_s19  }
  0x78   : > { %s2845_s6 = sshll.u32 %s290_s26, 5  ;;  %s289_s7 = scalar_lea.sflag [#allocation6], %s288_s23 }
  0x79   : > { %s292_s14 = scalar_lea.vmem [#allocation5], %s2845_s6  ;;  %p4507_p5 = scmp.ne.s32.totalorder %s4482_s30, 0 }
  0x7b   : > { %3732 = dma.done.wait (%p4507_p5), %s289_s7, 512  }
  0x7c   : > { %3734 = vsyncadd (%p4507_p5), %s289_s7, 4294966784  ;;  %p4508_p0 = scmp.eq.s32.totalorder %s3897_s29, 0 }
  0x7e   : > { %3736 = dma.done.wait (%p4508_p0), [#allocation6], 13312   ;;  %p4509_p11 = pmov %p4508_p0 }
  0x7f   : > { %p4510_p10 = pmov %p4508_p0 }
  0x80   : > { %3738 = vsyncadd (%p4509_p11), [#allocation6], 4294953984 }
  0x81   : > { %3740 = dma.done.wait (%p4510_p10), [#allocation9], 416   ;;  %p4511_p6 = pmov %p4508_p0 }
  0x82   : > { %s4091_s8 = scalar_lea.vmem [#allocation10], %s2844_s2  ;;  %s4093_s10 = scalar_lea.vmem [#allocation11], %s2845_s6 }
  0x83   : > { %3742 = vsyncadd (%p4511_p6), [#allocation9], 4294966880  ;;  %p2850_p7 = scmp.ne.s32.totalorder %s3777_s24, 0 }
  0x85   : > { %340 = sbr.rel (%p2850_p7) target bundleno = 141 (0x8d), region = 56 }
  0x8a   : > { %v341_v0 = vld [vmem:[%s292_s14] sm:$0xff]  ;;  %vm345_vm0 = vcmask 261120   ;;  %v342_v1 = vld [vmem:[%s292_s14 + $0x8] sm:$0xff]  ;;  %v343_v2 = vld [vmem:[%s292_s14 + $0x10] sm:$0xff] }
  0x8b   : > { %346 = vst.msk [vmem:[%s4093_s10] sm:$0xff] %vm345_vm0, %v341_v0  ;;  %347 = vst.msk [vmem:[%s4093_s10 + $0x8] sm:$0xff] %vm345_vm0, %v342_v1  ;;  %v344_v3 = vld [vmem:[%s292_s14 + $0x18] sm:$0xff] }
  0x8c   : > { %348 = vst.msk [vmem:[%s4093_s10 + $0x10] sm:$0xff] %vm345_vm0, %v343_v2  ;;  %349 = vst.msk [vmem:[%s4093_s10 + $0x18] sm:$0xff] %vm345_vm0, %v344_v3 }
  0x8d PF: > { %v362_v4 = vld [vmem:[#allocation7 + $0x198] sm:$0xff]  ;;  %v3804_v6 = vmov 0.0   ;;  %v361_v7 = vld [vmem:[#allocation7 + $0x190] sm:$0xff]  ;;  %v360_v9 = vld [vmem:[#allocation7 + $0x188] sm:$0xff]  ;;  %vm371_vm1 = vcmask 261120   ;;  %vm3805_vm2 = vmmov 0  }
  0x8e   : > { %v449_v5 = vld [vmem:[#allocation7 + $0x1b8] sm:$0xff]  ;;  %3054 = vmatprep.subr.mxu0 %v3804_v6  ;;  %3065 = vmatprep.subr.mxu1 %v3804_v6  ;;  %v448_v8 = vld [vmem:[#allocation7 + $0x1b0] sm:$0xff]  ;;  %v447_v10 = vld [vmem:[#allocation7 + $0x1a8] sm:$0xff]  ;;  %s2921_s29 = sshll.u32 %s3781_s25, 7  ;;  %s2670_s30 = sshll.u32 %s4093_s10, 4  ;;  %s4353_s30 = int_to_ptr.vmem [resolvable:$true] %s2670_s30 }
  0x8f   : > { %3055 = vmatpush3.msra.mxu0 %v362_v4  ;;  %3066 = vmatpush3.msra.mxu1 %v449_v5  ;;  %v359_v11 = vld [vmem:[#allocation7 + $0x180] sm:$0xff]  ;;  %v532_v14 = vld [vmem:[#allocation7 + $0x1d8] sm:$0xff]  ;;  %v531_v16 = vld [vmem:[#allocation7 + $0x1d0] sm:$0xff]  ;;  %s4512_s3 = sld [smem:[#allocation34_spill]]  ;;  %s4357_s16 = scalar_lea.sflag [#allocation12], %s290_s26 }
  0x90   : > { %3056 = vmatprep.subr.mxu0 %v3804_v6  ;;  %3067 = vmatprep.subr.mxu1 %v3804_v6  ;;  %v446_v12 = vld [vmem:[#allocation7 + $0x1a0] sm:$0xff]  ;;  %v615_v15 = vld [vmem:[#allocation7 + $0x1f8] sm:$0xff]  ;;  %v614_v17 = vld [vmem:[#allocation7 + $0x1f0] sm:$0xff]  ;;  %s3631_s4 = scalar_lea.vmem %s4353_s30, 512  ;;  %s3806_s0 = smov [#allocation11]  }
  0x91   : > { %3057 = vmatpush3.msra.mxu0 %v361_v7  ;;  %3068 = vmatpush3.msra.mxu1 %v448_v8  ;;  %v530_v18 = vld [vmem:[#allocation7 + $0x1c8] sm:$0xff]  ;;  %v529_v20 = vld [vmem:[#allocation7 + $0x1c0] sm:$0xff]  ;;  %v701_v23 = vld [vmem:[#allocation7 + $0x218] sm:$0xff]  ;;  %p3632_p1 = scmp.ne.s32.totalorder %s4353_s30, %s3631_s4  ;;  %s3635_s20 = sshll.u32 %s3806_s0, 4  ;;  %s3636_s20 = int_to_ptr.vmem [resolvable:$false] %s3635_s20 }
  0x92   : > { %3058 = vmatprep.subr.mxu0 %v3804_v6  ;;  %3069 = vmatprep.subr.mxu1 %v3804_v6  ;;  %v4107_v13 = vld [vmem:[%s4093_s10] sm:$0xff]  ;;  %v612_v21 = vld [vmem:[#allocation7 + $0x1e0] sm:$0xff]  ;;  %v4130_v22 = vld [vmem:[%s4093_s10 + $0x8] sm:$0xff]  ;;  %s3637_s21 = scalar_lea.vmem %s3636_s20, 1024  ;;  %p3638_p12 = scmp.lt.s32.totalorder %s4353_s30, %s3636_s20 }
  0x93   : > { %3059 = vmatpush3.msra.mxu0 %v360_v9  ;;  %3070 = vmatpush3.msra.mxu1 %v447_v10  ;;  %v613_v19 = vld [vmem:[#allocation7 + $0x1e8] sm:$0xff]  ;;  %v784_v24 = vld [vmem:[#allocation7 + $0x238] sm:$0xff]  ;;  %v700_v25 = vld [vmem:[#allocation7 + $0x210] sm:$0xff]  ;;  %p3633_p8 = pnand %p3632_p1, %p4005_p9  ;;  %p3639_p4 = scmp.lt.s32.totalorder %s3637_s21, %s3631_s4 }
  0x94   : > { %3060 = vmatprep.subr.mxu0 %v3804_v6  ;;  %3071 = vmatprep.subr.mxu1 %v3804_v6  ;;  %v783_v26 = vld [vmem:[#allocation7 + $0x230] sm:$0xff]  ;;  %v699_v27 = vld [vmem:[#allocation7 + $0x208] sm:$0xff]  ;;  %v698_v29 = vld [vmem:[#allocation7 + $0x200] sm:$0xff] }
  0x95   : > { %3061 = vmatpush3.msra.mxu0 %v359_v11  ;;  %3062 = vmatprep.mubr.msk.f32.mxu0 %vm3805_vm2, %v3804_v6  ;;  %v782_v28 = vld [vmem:[#allocation7 + $0x228] sm:$0xff]  ;;  %v781_v30 = vld [vmem:[#allocation7 + $0x220] sm:$0xff]  ;;  %v867_v31 = vld [vmem:[#allocation7 + $0x258] sm:$0xff]  ;;  %s4351_s18 = scalar_lea.hbm %s4512_s3, %s2921_s29  ;;  %p3634_p3 = pneg %p3633_p8 }
  0x96   : > { %3072 = vmatpush3.msra.mxu1 %v446_v12  ;;  %3063 = vmatmul.mubr.msk.f32.vlgmr.msra.gmra.mxu0 %vm371_vm1, %v4107_v13  ;;  %v953_v32 = vld [vmem:[#allocation7 + $0x278] sm:$0xff]  ;;  %v866_v33 = vld [vmem:[#allocation7 + $0x250] sm:$0xff]  ;;  %v865_v35 = vld [vmem:[#allocation7 + $0x248] sm:$0xff]  ;;  %p3640_p13 = por %p3639_p4, %p3638_p12 }
  0x97   : > { %3073 = vmatprep.mubr.msk.f32.mxu1 %vm3805_vm2, %v3804_v6  ;;  %3076 = vmatprep.subr.mxu0 %v3804_v6  ;;  %v952_v34 = vld [vmem:[#allocation7 + $0x270] sm:$0xff]  ;;  %v951_v36 = vld [vmem:[#allocation7 + $0x268] sm:$0xff]  ;;  %v864_v37 = vld [vmem:[#allocation7 + $0x240] sm:$0xff] }
  0x98   : > { %3087 = vmatprep.subr.mxu1 %v3804_v6  ;;  %3074 = vmatmul.mubr.msk.f32.vlgmr.msra.gmra.mxu1 %vm371_vm1, %v4107_v13  ;;  %v950_v38 = vld [vmem:[#allocation7 + $0x260] sm:$0xff]  ;;  %v1036_v40 = vld [vmem:[#allocation7 + $0x298] sm:$0xff]  ;;  %v1035_v42 = vld [vmem:[#allocation7 + $0x290] sm:$0xff]  ;;  %p3641_p2 = pnand %p3640_p13, %p3634_p3 }
  0x99   : > { %3077 = vmatpush3.msra.mxu0 %v532_v14  ;;  %3088 = vmatpush3.msra.mxu1 %v615_v15  ;;  %v4161_v39 = vld [vmem:[%s4093_s10 + $0x10] sm:$0xff]  ;;  %v1118_v43 = vld [vmem:[#allocation7 + $0x2b0] sm:$0xff]  ;;  %v1034_v44 = vld [vmem:[#allocation7 + $0x288] sm:$0xff] }
  0x9a   : > { %3078 = vmatprep.subr.mxu0 %v3804_v6  ;;  %3089 = vmatprep.subr.mxu1 %v3804_v6  ;;  %v1119_v41 = vld [vmem:[#allocation7 + $0x2b8] sm:$0xff]  ;;  %v1117_v45 = vld [vmem:[#allocation7 + $0x2a8] sm:$0xff]  ;;  %v1033_v46 = vld [vmem:[#allocation7 + $0x280] sm:$0xff] }
  0x9b   : > { %3079 = vmatpush3.msra.mxu0 %v531_v16  ;;  %3090 = vmatpush3.msra.mxu1 %v614_v17  ;;  %v1116_v47 = vld [vmem:[#allocation7 + $0x2a0] sm:$0xff]  ;;  %v1205_v49 = vld [vmem:[#allocation7 + $0x2d8] sm:$0xff]  ;;  %v1204_v51 = vld [vmem:[#allocation7 + $0x2d0] sm:$0xff] }
  0x9c   : > { %3080 = vmatprep.subr.mxu0 %v3804_v6  ;;  %3091 = vmatprep.subr.mxu1 %v3804_v6  ;;  %v4184_v48 = vld [vmem:[%s4093_s10 + $0x18] sm:$0xff]  ;;  %v1288_v50 = vld [vmem:[#allocation7 + $0x2f8] sm:$0xff]  ;;  %v1287_v52 = vld [vmem:[#allocation7 + $0x2f0] sm:$0xff] }
  0x9d   : > { %3081 = vmatpush3.msra.mxu0 %v530_v18  ;;  %3092 = vmatpush3.msra.mxu1 %v613_v19  ;;  %v1203_v53 = vld [vmem:[#allocation7 + $0x2c8] sm:$0xff]  ;;  %v1202_v55 = vld [vmem:[#allocation7 + $0x2c0] sm:$0xff]  ;;  %v1370_v57 = vld [vmem:[#allocation7 + $0x18] sm:$0xff] }
  0x9e   : > { %3082 = vmatprep.subr.mxu0 %v3804_v6  ;;  %3093 = vmatprep.subr.mxu1 %v3804_v6  ;;  %v1286_v54 = vld [vmem:[#allocation7 + $0x2e8] sm:$0xff]  ;;  %v1285_v56 = vld [vmem:[#allocation7 + $0x2e0] sm:$0xff]  ;;  %v1455_v58 = vld [vmem:[#allocation7 + $0x38] sm:$0xff] }
  0x9f   : > { %3083 = vmatpush3.msra.mxu0 %v529_v20  ;;  %3084 = vmatprep.mubr.msk.f32.mxu0 %vm3805_vm2, %v3804_v6  ;;  %v1369_v59 = vld [vmem:[#allocation7 + $0x10] sm:$0xff]  ;;  %v1368_v61 = vld [vmem:[#allocation7 + $0x8] sm:$0xff]  ;;  %v1367_v63 = vld [vmem:[#allocation7] sm:$0xff] }
  0xa0   : > { %3094 = vmatpush3.msra.mxu1 %v612_v21  ;;  %3085 = vmatmul.mubr.msk.f32.vlgmr.msra.gmra.mxu0 %vm371_vm1, %v4107_v13  ;;  %v1454_v60 = vld [vmem:[#allocation7 + $0x30] sm:$0xff]  ;;  %v1453_v62 = vld [vmem:[#allocation7 + $0x28] sm:$0xff]  ;;  %v1452_v0 = vld [vmem:[#allocation7 + $0x20] sm:$0xff] }
  0xa1   : > { %3095 = vmatprep.mubr.msk.f32.mxu1 %vm3805_vm2, %v3804_v6  ;;  %3098 = vmatprep.subr.mxu0 %v3804_v6  ;;  %v350_v1 = vld [vmem:[%s4069_s11] sm:$0xff]  ;;  %v1536_v4 = vld [vmem:[#allocation7 + $0x48] sm:$0xff]  ;;  %v1535_v5 = vld [vmem:[#allocation7 + $0x40] sm:$0xff] }
  0xa2   : > { %3109 = vmatprep.subr.mxu1 %v3804_v6  ;;  %3096 = vmatmul.mubr.msk.f32.vlgmr.msra.gmra.mxu1 %vm371_vm1, %v4130_v22  ;;  %v1538_v2 = vld [vmem:[#allocation7 + $0x58] sm:$0xff]  ;;  %v1537_v3 = vld [vmem:[#allocation7 + $0x50] sm:$0xff]  ;;  %v1641_v11 = vld [vmem:[#allocation7 + $0x68] sm:$0xff] }
  0xa3   : > { %3099 = vmatpush3.msra.mxu0 %v701_v23  ;;  %3110 = vmatpush3.msra.mxu1 %v784_v24  ;;  %v1643_v7 = vld [vmem:[#allocation7 + $0x78] sm:$0xff]  ;;  %v1642_v9 = vld [vmem:[#allocation7 + $0x70] sm:$0xff]  ;;  %v1727_v12 = vld [vmem:[#allocation7 + $0x88] sm:$0xff] }
  0xa4   : > { %3100 = vmatprep.subr.mxu0 %v3804_v6  ;;  %3111 = vmatprep.subr.mxu1 %v3804_v6  ;;  %v1729_v8 = vld [vmem:[#allocation7 + $0x98] sm:$0xff]  ;;  %v1728_v10 = vld [vmem:[#allocation7 + $0x90] sm:$0xff]  ;;  %v1640_v14 = vld [vmem:[#allocation7 + $0x60] sm:$0xff] }
  0xa5   : > { %3101 = vmatpush3.msra.mxu0 %v700_v25  ;;  %3112 = vmatpush3.msra.mxu1 %v783_v26  ;;  %v1726_v15 = vld [vmem:[#allocation7 + $0x80] sm:$0xff] }
  0xa6   : > { %3102 = vmatprep.subr.mxu0 %v3804_v6  ;;  %3113 = vmatprep.subr.mxu1 %v3804_v6 }
  0xa7   : > { %3103 = vmatpush3.msra.mxu0 %v699_v27  ;;  %3114 = vmatpush3.msra.mxu1 %v782_v28 }
  0xa8   : > { %3104 = vmatprep.subr.mxu0 %v3804_v6  ;;  %3115 = vmatprep.subr.mxu1 %v3804_v6 }
  0xa9   : > { %3105 = vmatpush3.msra.mxu0 %v698_v29  ;;  %3106 = vmatprep.mubr.msk.f32.mxu0 %vm3805_vm2, %v3804_v6 }
  0xaa   : > { %3116 = vmatpush3.msra.mxu1 %v781_v30  ;;  %3107 = vmatmul.mubr.msk.f32.vlgmr.msra.gmra.mxu0 %vm371_vm1, %v4130_v22 }
  0xab   : > { %3117 = vmatprep.mubr.msk.f32.mxu1 %vm3805_vm2, %v3804_v6  ;;  %3120 = vmatprep.subr.mxu0 %v3804_v6 }
  0xac   : > { %3131 = vmatprep.subr.mxu1 %v3804_v6  ;;  %3118 = vmatmul.mubr.msk.f32.vlgmr.msra.gmra.mxu1 %vm371_vm1, %v4130_v22 }
  0xad   : > { %3121 = vmatpush3.msra.mxu0 %v867_v31  ;;  %3132 = vmatpush3.msra.mxu1 %v953_v32 }
  0xae   : > { %3122 = vmatprep.subr.mxu0 %v3804_v6  ;;  %3133 = vmatprep.subr.mxu1 %v3804_v6 }
  0xaf   : > { %3123 = vmatpush3.msra.mxu0 %v866_v33  ;;  %3134 = vmatpush3.msra.mxu1 %v952_v34 }
  0xb0   : > { %3124 = vmatprep.subr.mxu0 %v3804_v6  ;;  %3135 = vmatprep.subr.mxu1 %v3804_v6 }
  0xb1   : > { %3125 = vmatpush3.msra.mxu0 %v865_v35  ;;  %3136 = vmatpush3.msra.mxu1 %v951_v36 }
  0xb2   : > { %3126 = vmatprep.subr.mxu0 %v3804_v6  ;;  %3137 = vmatprep.subr.mxu1 %v3804_v6 }
  0xb3   : > { %3127 = vmatpush3.msra.mxu0 %v864_v37  ;;  %3128 = vmatprep.mubr.msk.f32.mxu0 %vm3805_vm2, %v3804_v6 }
  0xb4   : > { %3138 = vmatpush3.msra.mxu1 %v950_v38  ;;  %3129 = vmatmul.mubr.msk.f32.vlgmr.msra.gmra.mxu0 %vm371_vm1, %v4161_v39 }
  0xb5   : > { %3139 = vmatprep.mubr.msk.f32.mxu1 %vm3805_vm2, %v3804_v6  ;;  %3142 = vmatprep.subr.mxu0 %v3804_v6 }
  0xb6   : > { %3153 = vmatprep.subr.mxu1 %v3804_v6  ;;  %3140 = vmatmul.mubr.msk.f32.vlgmr.msra.gmra.mxu1 %vm371_vm1, %v4161_v39 }
  0xb7   : > { %3143 = vmatpush3.msra.mxu0 %v1036_v40  ;;  %3154 = vmatpush3.msra.mxu1 %v1119_v41 }
  0xb8   : > { %3144 = vmatprep.subr.mxu0 %v3804_v6  ;;  %3155 = vmatprep.subr.mxu1 %v3804_v6 }
  0xb9   : > { %3145 = vmatpush3.msra.mxu0 %v1035_v42  ;;  %3156 = vmatpush3.msra.mxu1 %v1118_v43  ;;  %v2854_v42 = vld [vmem:[#allocation8 + $0xc] ss:$0 sm:$0xff]  ;;  %v2878_v43 = vld [vmem:[#allocation8] ss:$0 sm:$0xff] }
  0xba   : > { %3146 = vmatprep.subr.mxu0 %v3804_v6  ;;  %3157 = vmatprep.subr.mxu1 %v3804_v6 }
  0xbb   : > { %3147 = vmatpush3.msra.mxu0 %v1034_v44  ;;  %3158 = vmatpush3.msra.mxu1 %v1117_v45 }
  0xbc   : > { %3148 = vmatprep.subr.mxu0 %v3804_v6  ;;  %3159 = vmatprep.subr.mxu1 %v3804_v6 }
  0xbd   : > { %3149 = vmatpush3.msra.mxu0 %v1033_v46  ;;  %3150 = vmatprep.mubr.msk.f32.mxu0 %vm3805_vm2, %v3804_v6 }
  0xbe   : > { %3160 = vmatpush3.msra.mxu1 %v1116_v47  ;;  %3151 = vmatmul.mubr.msk.f32.vlgmr.msra.gmra.mxu0 %vm371_vm1, %v4161_v39 }
  0xbf   : > { %3161 = vmatprep.mubr.msk.f32.mxu1 %vm3805_vm2, %v3804_v6  ;;  %3164 = vmatprep.subr.mxu0 %v3804_v6 }
  0xc0   : > { %3175 = vmatprep.subr.mxu1 %v3804_v6  ;;  %3162 = vmatmul.mubr.msk.f32.vlgmr.msra.gmra.mxu1 %vm371_vm1, %v4184_v48 }
  0xc1   : > { %3165 = vmatpush3.msra.mxu0 %v1205_v49  ;;  %3176 = vmatpush3.msra.mxu1 %v1288_v50  ;;  %v2880_v49 = vld [vmem:[#allocation8 + $0x1] ss:$0 sm:$0xff] }
  0xc2   : > { %3166 = vmatprep.subr.mxu0 %v3804_v6  ;;  %3177 = vmatprep.subr.mxu1 %v3804_v6 }
  0xc3   : > { %3167 = vmatpush3.msra.mxu0 %v1204_v51  ;;  %3178 = vmatpush3.msra.mxu1 %v1287_v52 }
  0xc4   : > { %3168 = vmatprep.subr.mxu0 %v3804_v6  ;;  %3179 = vmatprep.subr.mxu1 %v3804_v6 }
  0xc5   : > { %3169 = vmatpush3.msra.mxu0 %v1203_v53  ;;  %3180 = vmatpush3.msra.mxu1 %v1286_v54  ;;  %v2856_v53 = vld [vmem:[#allocation8 + $0xd] ss:$0 sm:$0xff] }
  0xc6   : > { %3170 = vmatprep.subr.mxu0 %v3804_v6  ;;  %3181 = vmatprep.subr.mxu1 %v3804_v6 }
  0xc7   : > { %3171 = vmatpush3.msra.mxu0 %v1202_v55  ;;  %3172 = vmatprep.mubr.msk.f32.mxu0 %vm3805_vm2, %v3804_v6 }
  0xc8   : > { %3182 = vmatpush3.msra.mxu1 %v1285_v56  ;;  %3173 = vmatmul.mubr.msk.f32.vlgmr.msra.gmra.mxu0 %vm371_vm1, %v4184_v48 }
  0xc9   : > { %3183 = vmatprep.mubr.msk.f32.mxu1 %vm3805_vm2, %v3804_v6  ;;  %3186 = vmatprep.subr.mxu0 %v3804_v6 }
  0xca   : > { %3197 = vmatprep.subr.mxu1 %v3804_v6  ;;  %3184 = vmatmul.mubr.msk.f32.vlgmr.msra.gmra.mxu1 %vm371_vm1, %v4184_v48 }
  0xcb   : > { %3187 = vmatpush3.msra.mxu0 %v1370_v57  ;;  %3198 = vmatpush3.msra.mxu1 %v1455_v58 }
  0xcc   : > { %3188 = vmatprep.subr.mxu0 %v3804_v6  ;;  %3199 = vmatprep.subr.mxu1 %v3804_v6 }
  0xcd   : > { %3189 = vmatpush3.msra.mxu0 %v1369_v59  ;;  %3200 = vmatpush3.msra.mxu1 %v1454_v60 }
  0xce   : > { %3190 = vmatprep.subr.mxu0 %v3804_v6  ;;  %3201 = vmatprep.subr.mxu1 %v3804_v6 }
  0xcf   : > { %3191 = vmatpush3.msra.mxu0 %v1368_v61  ;;  %3202 = vmatpush3.msra.mxu1 %v1453_v62 }
  0xd0   : > { %3192 = vmatprep.subr.mxu0 %v3804_v6  ;;  %3203 = vmatprep.subr.mxu1 %v3804_v6 }
  0xd1   : > { %3193 = vmatpush3.msra.mxu0 %v1367_v63  ;;  %3194 = vmatprep.mubr.msk.f32.mxu0 %vm3805_vm2, %v3804_v6 }
  0xd2   : > { %3204 = vmatpush3.msra.mxu1 %v1452_v0  ;;  %3205 = vmatprep.mubr.msk.f32.mxu1 %vm3805_vm2, %v3804_v6  ;;  %v2858_v0 = vld [vmem:[#allocation8 + $0xe] ss:$0 sm:$0xff] }
  0xd3   : > { %3195 = vmatmul.mubr.msk.f32.vlgmr.msra.gmra.mxu0 %vm371_vm1, %v350_v1  ;;  %3206 = vmatmul.mubr.msk.f32.vlgmr.msra.gmra.mxu1 %vm371_vm1, %v350_v1 }
  0xd4   : > { %3208 = vmatprep.subr.mxu0 %v3804_v6  ;;  %3216 = vmatprep.mubr.msk.f32.mxu0 %vm3805_vm2, %v3804_v6 }
  0xd5   : > { %3209 = vmatpush3.msra.mxu0 %v1538_v2  ;;  %3219 = vmatprep.subr.mxu1 %v3804_v6 }
  0xd6   : > { %3210 = vmatprep.subr.mxu0 %v3804_v6  ;;  %3227 = vmatprep.mubr.msk.f32.mxu1 %vm3805_vm2, %v3804_v6 }
  0xd7   : > { %3211 = vmatpush3.msra.mxu0 %v1537_v3  ;;  %3220 = vmatpush3.msra.mxu1 %v1643_v7 }
  0xd8   : > { %3212 = vmatprep.subr.mxu0 %v3804_v6  ;;  %3221 = vmatprep.subr.mxu1 %v3804_v6 }
  0xd9   : > { %3213 = vmatpush3.msra.mxu0 %v1536_v4  ;;  %3222 = vmatpush3.msra.mxu1 %v1642_v9 }
  0xda   : > { %3214 = vmatprep.subr.mxu0 %v3804_v6  ;;  %3223 = vmatprep.subr.mxu1 %v3804_v6 }
  0xdb   : > { %3215 = vmatpush3.msra.mxu0 %v1535_v5  ;;  %3224 = vmatpush3.msra.mxu1 %v1641_v11 }
  0xdc   : > { %3217 = vmatmul.mubr.msk.f32.vlgmr.msra.gmra.mxu0 %vm371_vm1, %v350_v1  ;;  %3230 = vmatprep.subr.mxu0 %v3804_v6  ;;  %v2882_v1 = vld [vmem:[#allocation8 + $0x2] ss:$0 sm:$0xff] }
  0xdd   : > { %3238 = vmatprep.mubr.msk.f32.mxu0 %vm3805_vm2, %v3804_v6  ;;  %3231 = vmatpush3.msra.mxu0 %v1729_v8 }
  0xde   : > { %3232 = vmatprep.subr.mxu0 %v3804_v6  ;;  %3225 = vmatprep.subr.mxu1 %v3804_v6 }
  0xdf   : > { %3233 = vmatpush3.msra.mxu0 %v1728_v10  ;;  %3226 = vmatpush3.msra.mxu1 %v1640_v14 }
  0xe0   : > { %3234 = vmatprep.subr.mxu0 %v3804_v6  ;;  %3241 = vmatprep.subr.mxu1 %v3804_v6 }
  0xe1   : > { %3235 = vmatpush3.msra.mxu0 %v1727_v12 }
  0xe2   : > { %3236 = vmatprep.subr.mxu0 %v3804_v6 }
  0xe3   : > { %3237 = vmatpush3.msra.mxu0 %v1726_v15 }
  0xe4   : > { %3252 = vmatprep.subr.mxu0 %v3804_v6 }
 0x156   : > { %v441_v16 = vpop.f32.mrf.mxu0 }
 0x157   : > { %v442_v46 = vadd.f32 %v2854_v42, %v441_v16  ;;  %v1812_v16 = vld [vmem:[#allocation7 + $0xb8] sm:$0xff] }
 0x158   : > { %v3064_v17 = vpop.f32.mrf.mxu0  ;;  %v524_v18 = vpop.f32.mrf.mxu1 }
 0x159   : > { %v525_v56 = vadd.f32 %v2856_v53, %v524_v18  ;;  %v1811_v17 = vld [vmem:[#allocation7 + $0xb0] sm:$0xff]  ;;  %v1810_v18 = vld [vmem:[#allocation7 + $0xa8] sm:$0xff] }
 0x15a   : > { %v3075_v19 = vpop.f32.mrf.mxu1 }
 0x15b   : > { %v1917_v19 = vld [vmem:[#allocation7 + $0xd8] sm:$0xff] }
 0x160   : > { %v607_v20 = vpop.f32.mrf.mxu0 }
 0x161   : > { %v608_v3 = vadd.f32 %v2858_v0, %v607_v20  ;;  %v2003_v20 = vld [vmem:[#allocation7 + $0xf8] sm:$0xff] }
 0x162   : > { %v3086_v21 = vpop.f32.mrf.mxu0  ;;  %v4244_v23 = vpop.f32.mrf.mxu1 }
 0x163   : > { %v1916_v21 = vld [vmem:[#allocation7 + $0xd0] sm:$0xff] }
 0x164   : > { %v3097_v24 = vpop.f32.mrf.mxu1 }
 0x165   : > { %v2002_v24 = vld [vmem:[#allocation7 + $0xf0] sm:$0xff] }
 0x16a   : > { %v4246_v25 = vpop.f32.mrf.mxu0 }
 0x16c   : > { %v3108_v26 = vpop.f32.mrf.mxu0  ;;  %v4248_v27 = vpop.f32.mrf.mxu1 }
 0x16d   : > { %v1915_v26 = vld [vmem:[#allocation7 + $0xc8] sm:$0xff] }
 0x16e   : > { %v3119_v28 = vpop.f32.mrf.mxu1 }
 0x16f   : > { %v2001_v28 = vld [vmem:[#allocation7 + $0xe8] sm:$0xff] }
 0x174   : > { %v4250_v29 = vpop.f32.mrf.mxu0 }
 0x176   : > { %v3130_v30 = vpop.f32.mrf.mxu0  ;;  %v4252_v31 = vpop.f32.mrf.mxu1 }
 0x177   : > { %v1914_v30 = vld [vmem:[#allocation7 + $0xc0] sm:$0xff] }
 0x178   : > { %v3141_v32 = vpop.f32.mrf.mxu1 }
 0x179   : > { %v2000_v32 = vld [vmem:[#allocation7 + $0xe0] sm:$0xff] }
 0x17e   : > { %v4254_v33 = vpop.f32.mrf.mxu0 }
 0x180   : > { %v3152_v34 = vpop.f32.mrf.mxu0  ;;  %v4256_v35 = vpop.f32.mrf.mxu1 }
 0x181   : > { %v2860_v34 = vld [vmem:[#allocation8 + $0xf] ss:$0 sm:$0xff] }
 0x182   : > { %v3163_v36 = vpop.f32.mrf.mxu1  ;;  %v694_v42 = vadd.f32 %v2860_v34, %v4244_v23 }
 0x183   : > { %v2886_v36 = vld [vmem:[#allocation8 + $0x3] ss:$0 sm:$0xff] }
 0x188   : > { %v4258_v37 = vpop.f32.mrf.mxu0 }
 0x18a   : > { %v3174_v38 = vpop.f32.mrf.mxu0  ;;  %v4260_v40 = vpop.f32.mrf.mxu1 }
 0x18c   : > { %v3185_v41 = vpop.f32.mrf.mxu1 }
 0x193   : > { %v1447_v44 = vpop.f32.mrf.mxu0  ;;  %v1530_v45 = vpop.f32.mrf.mxu1 }
 0x194   : > { %v1448_v47 = vadd.f32 %v2878_v43, %v1447_v44  ;;  %v1531_v55 = vadd.f32 %v2880_v49, %v1530_v45  ;;  %v2888_v44 = vld [vmem:[#allocation8 + $0x4] ss:$0 sm:$0xff]  ;;  %v2862_v49 = vld [vmem:[#allocation8 + $0x10] ss:$0 sm:$0xff] }
 0x195   : > { %v3196_v50 = vpop.f32.mrf.mxu0  ;;  %v3207_v51 = vpop.f32.mrf.mxu1 }
 0x196   : > { %v1617_v52 = vadd.f32 %v1448_v47, %v442_v46  ;;  %v1624_v57 = vadd.f32 %v1531_v55, %v525_v56 }
 0x198   : > { %v2884_v54 = vmul.f32 -1.442695, %v1617_v52  ;;  %v2885_v60 = vmul.f32 -1.442695, %v1624_v57  ;;  %v777_v52 = vadd.f32 %v2862_v49, %v4246_v25 }
 0x19a   : > { %3483 = vpow2.f32 %v2884_v54 }
 0x19b   : > { %3485 = vpow2.f32 %v2885_v60 }
 0x19c   : > { %v1613_v58 = vpop.f32.mrf.mxu0 }
 0x19d   : > { %v1614_v4 = vadd.f32 %v2882_v1, %v1613_v58 }
 0x19e   : > { %v3218_v59 = vpop.f32.mrf.mxu0 }
 0x19f   : > { %v2864_v59 = vld [vmem:[#allocation8 + $0x11] ss:$0 sm:$0xff] }
 0x1a7   : > { %v3484_v61 = vpop.eup %3483 }
 0x1a8   : > { %v1621_v62 = vadd.f32 1.0, %v3484_v61  ;;  %v3486_v63 = vpop.eup %3485  ;;  %v2890_v61 = vld [vmem:[#allocation8 + $0x5] ss:$0 sm:$0xff] }
 0x1a9   : > { %v1628_v2 = vadd.f32 1.0, %v3486_v63 }
 0x1aa   : > { %3487 = vrcp.f32 %v1621_v62  ;;  %v860_v62 = vadd.f32 %v2864_v59, %v4248_v27  ;;  %v2085_v27 = vld [vmem:[#allocation7 + $0x110] sm:$0xff] }
 0x1ab   : > { %3489 = vrcp.f32 %v1628_v2 }
 0x1b7   : > { %v3488_v5 = vpop.eup %3487 }
 0x1b8   : > { %v1631_v7 = vmul.f32 %v3488_v5, %v608_v3  ;;  %v3490_v9 = vpop.eup %3489 }
 0x1b9   : > { %v1634_v10 = vsub.f32 1.0, %v3490_v9  ;;  %v1636_v14 = vmul.f32 %v3490_v9, %v4107_v13  ;;  %v1809_v13 = vld [vmem:[#allocation7 + $0xa0] sm:$0xff]  ;;  %v2086_v9 = vld [vmem:[#allocation7 + $0x118] sm:$0xff] }
 0x1ba   : > { %v1632_v8 = vadd.f32 %v1631_v7, %v1614_v4 }
 0x1bc   : > { %3491 = vtanh.f32 %v1632_v8 }
 0x1c9   : > { %v3492_v11 = vpop.eup %3491 }
 0x1ca   : > { %v1635_v12 = vmul.f32 %v3492_v11, %v1634_v10  ;;  %v2084_v10 = vld [vmem:[#allocation7 + $0x108] sm:$0xff]  ;;  %v2191_v11 = vld [vmem:[#allocation7 + $0x138] sm:$0xff] }
 0x1cc   : > { %v1637_v15 = vadd.f32 %v1636_v14, %v1635_v12  ;;  %v2277_v12 = vld [vmem:[#allocation7 + $0x158] sm:$0xff]  ;;  %v2190_v14 = vld [vmem:[#allocation7 + $0x130] sm:$0xff] }
 0x1ce   : > { %1638 = vst.msk [vmem:[%s4093_s10] sm:$0xff] %vm371_vm1, %v1637_v15  ;;  %3228 = vmatmul.mubr.msk.f32.vlgmr.msra.gmra.mxu1 %vm371_vm1, %v1637_v15  ;;  %3239 = vmatmul.mubr.msk.f32.vlgmr.msra.gmra.mxu0 %vm371_vm1, %v1637_v15 }
 0x1cf   : > { %3242 = vmatpush3.msra.mxu1 %v1812_v16  ;;  %3249 = vmatprep.mubr.msk.f32.mxu1 %vm3805_vm2, %v3804_v6  ;;  %v2189_v16 = vld [vmem:[#allocation7 + $0x128] sm:$0xff] }
 0x1d0   : > { %3243 = vmatprep.subr.mxu1 %v3804_v6  ;;  %3260 = vmatprep.mubr.msk.f32.mxu0 %vm3805_vm2, %v3804_v6 }
 0x1d1   : > { %3244 = vmatpush3.msra.mxu1 %v1811_v17  ;;  %3253 = vmatpush3.msra.mxu0 %v1917_v19  ;;  %v2275_v17 = vld [vmem:[#allocation7 + $0x148] sm:$0xff]  ;;  %v2866_v19 = vld [vmem:[#allocation8 + $0x12] ss:$0 sm:$0xff] }
 0x1d2   : > { %3245 = vmatprep.subr.mxu1 %v3804_v6  ;;  %3254 = vmatprep.subr.mxu0 %v3804_v6 }
 0x1d3   : > { %3246 = vmatpush3.msra.mxu1 %v1810_v18  ;;  %3255 = vmatpush3.msra.mxu0 %v1916_v21  ;;  %v2188_v18 = vld [vmem:[#allocation7 + $0x120] sm:$0xff] }
 0x1d4   : > { %3247 = vmatprep.subr.mxu1 %v3804_v6  ;;  %3256 = vmatprep.subr.mxu0 %v3804_v6 }
 0x1d5   : > { %3248 = vmatpush3.msra.mxu1 %v1809_v13  ;;  %3257 = vmatpush3.msra.mxu0 %v1915_v26  ;;  %v2274_v13 = vld [vmem:[#allocation7 + $0x140] sm:$0xff]  ;;  %v946_v26 = vadd.f32 %v2866_v19, %v4250_v29 }
 0x1d6   : > { %3250 = vmatmul.mubr.msk.f32.vlgmr.msra.gmra.mxu1 %vm371_vm1, %v1637_v15  ;;  %3263 = vmatprep.subr.mxu1 %v3804_v6  ;;  %v2276_v15 = vld [vmem:[#allocation7 + $0x150] sm:$0xff] }
 0x1d7   : > { %3271 = vmatprep.mubr.msk.f32.mxu1 %vm3805_vm2, %v3804_v6  ;;  %3264 = vmatpush3.msra.mxu1 %v2003_v20  ;;  %v2895_v20 = vld [vmem:[#allocation8 + $0x6] ss:$0 sm:$0xff] }
 0x1d8   : > { %3265 = vmatprep.subr.mxu1 %v3804_v6  ;;  %3258 = vmatprep.subr.mxu0 %v3804_v6 }
 0x1d9   : > { %3266 = vmatpush3.msra.mxu1 %v2002_v24  ;;  %3259 = vmatpush3.msra.mxu0 %v1914_v30  ;;  %v2897_v30 = vld [vmem:[#allocation8 + $0x7] ss:$0 sm:$0xff] }
 0x1da   : > { %3267 = vmatprep.subr.mxu1 %v3804_v6  ;;  %3274 = vmatprep.subr.mxu0 %v3804_v6 }
 0x1db   : > { %3268 = vmatpush3.msra.mxu1 %v2001_v28 }
 0x1dc   : > { %3269 = vmatprep.subr.mxu1 %v3804_v6 }
 0x1dd   : > { %3270 = vmatpush3.msra.mxu1 %v2000_v32 }
 0x1de   : > { %3285 = vmatprep.subr.mxu1 %v3804_v6 }
 0x28e   : > { %v1721_v38 = vpop.f32.mrf.mxu1  ;;  %v1804_v41 = vpop.f32.mrf.mxu0 }
 0x28f   : > { %v1722_v43 = vadd.f32 %v2886_v36, %v1721_v38  ;;  %v1805_v51 = vadd.f32 %v2888_v44, %v1804_v41  ;;  %v2868_v38 = vld [vmem:[#allocation8 + $0x13] ss:$0 sm:$0xff] }
 0x290   : > { %v3229_v45 = vpop.f32.mrf.mxu1  ;;  %v3240_v46 = vpop.f32.mrf.mxu0 }
 0x291   : > { %v1891_v47 = vadd.f32 %v1722_v43, %v694_v42  ;;  %v1898_v54 = vadd.f32 %v1805_v51, %v777_v52  ;;  %v1029_v43 = vadd.f32 %v2868_v38, %v4252_v31  ;;  %v2870_v51 = vld [vmem:[#allocation8 + $0x14] ss:$0 sm:$0xff] }
 0x293   : > { %v2892_v50 = vmul.f32 -1.442695, %v1891_v47  ;;  %v2893_v56 = vmul.f32 -1.442695, %v1898_v54  ;;  %v1112_v54 = vadd.f32 %v2870_v51, %v4254_v33  ;;  %v2359_v33 = vld [vmem:[#allocation7 + $0x170] sm:$0xff] }
 0x295   : > { %3493 = vpow2.f32 %v2892_v50 }
 0x296   : > { %v1887_v53 = vpop.f32.mrf.mxu1  ;;  %3495 = vpow2.f32 %v2893_v56 }
 0x297   : > { %v1888_v0 = vadd.f32 %v2890_v61, %v1887_v53  ;;  %v2899_v53 = vld [vmem:[#allocation8 + $0x8] ss:$0 sm:$0xff] }
 0x298   : > { %v3251_v55 = vpop.f32.mrf.mxu1 }
 0x2a2   : > { %v3494_v57 = vpop.eup %3493 }
 0x2a3   : > { %v1895_v58 = vadd.f32 1.0, %v3494_v57  ;;  %v3496_v23 = vpop.eup %3495 }
 0x2a4   : > { %v1902_v60 = vadd.f32 1.0, %v3496_v23 }
 0x2a5   : > { %3497 = vrcp.f32 %v1895_v58 }
 0x2a6   : > { %3499 = vrcp.f32 %v1902_v60 }
 0x2b2   : > { %v3498_v63 = vpop.eup %3497 }
 0x2b3   : > { %v1905_v25 = vmul.f32 %v3498_v63, %v860_v62  ;;  %v3500_v2 = vpop.eup %3499  ;;  %v2360_v63 = vld [vmem:[#allocation7 + $0x178] sm:$0xff] }
 0x2b4   : > { %v1908_v3 = vsub.f32 1.0, %v3500_v2  ;;  %v1910_v7 = vmul.f32 %v3500_v2, %v4130_v22  ;;  %v2083_v22 = vld [vmem:[#allocation7 + $0x100] sm:$0xff]  ;;  %v2463_v2 = vld [vmem:[#allocation7 + $0x308] sm:$0xff] }
 0x2b5   : > { %v1906_v1 = vadd.f32 %v1905_v25, %v1888_v0  ;;  %v2358_v0 = vld [vmem:[#allocation7 + $0x168] sm:$0xff]  ;;  %v2465_v25 = vld [vmem:[#allocation7 + $0x318] sm:$0xff] }
 0x2b7   : > { %3501 = vtanh.f32 %v1906_v1  ;;  %v2464_v1 = vld [vmem:[#allocation7 + $0x310] sm:$0xff] }
 0x2c4   : > { %v3502_v4 = vpop.eup %3501 }
 0x2c5   : > { %v1909_v5 = vmul.f32 %v3502_v4, %v1908_v3  ;;  %v2462_v3 = vld [vmem:[#allocation7 + $0x300] sm:$0xff]  ;;  %v2554_v4 = vld [vmem:[#allocation7 + $0x338] sm:$0xff] }
 0x2c7   : > { %v1911_v8 = vadd.f32 %v1910_v7, %v1909_v5  ;;  %v2872_v5 = vld [vmem:[#allocation8 + $0x15] ss:$0 sm:$0xff]  ;;  %v2904_v7 = vld [vmem:[#allocation8 + $0x9] ss:$0 sm:$0xff] }
 0x2c9   : > { %2894 = vst.msk [vmem:[%s4093_s10 + $0x8] sm:$0xff] %vm371_vm1, %v1911_v8  ;;  %3261 = vmatmul.mubr.msk.f32.vlgmr.msra.gmra.mxu0 %vm371_vm1, %v1911_v8  ;;  %3272 = vmatmul.mubr.msk.f32.vlgmr.msra.gmra.mxu1 %vm371_vm1, %v1911_v8 }
 0x2ca   : > { %3275 = vmatpush3.msra.mxu0 %v2086_v9  ;;  %3282 = vmatprep.mubr.msk.f32.mxu0 %vm3805_vm2, %v3804_v6 }
 0x2cb   : > { %3276 = vmatprep.subr.mxu0 %v3804_v6  ;;  %3293 = vmatprep.mubr.msk.f32.mxu1 %vm3805_vm2, %v3804_v6 }
 0x2cc   : > { %3277 = vmatpush3.msra.mxu0 %v2085_v27  ;;  %3286 = vmatpush3.msra.mxu1 %v2191_v11  ;;  %v1198_v27 = vadd.f32 %v2872_v5, %v4256_v35 }
 0x2cd   : > { %3278 = vmatprep.subr.mxu0 %v3804_v6  ;;  %3287 = vmatprep.subr.mxu1 %v3804_v6 }
 0x2ce   : > { %3279 = vmatpush3.msra.mxu0 %v2084_v10  ;;  %3288 = vmatpush3.msra.mxu1 %v2190_v14 }
 0x2cf   : > { %3280 = vmatprep.subr.mxu0 %v3804_v6  ;;  %3289 = vmatprep.subr.mxu1 %v3804_v6 }
 0x2d0   : > { %3281 = vmatpush3.msra.mxu0 %v2083_v22  ;;  %3290 = vmatpush3.msra.mxu1 %v2189_v16  ;;  %v2906_v22 = vld [vmem:[#allocation8 + $0xa] ss:$0 sm:$0xff] }
 0x2d1   : > { %3283 = vmatmul.mubr.msk.f32.vlgmr.msra.gmra.mxu0 %vm371_vm1, %v1911_v8  ;;  %3296 = vmatprep.subr.mxu0 %v3804_v6 }
 0x2d2   : > { %3304 = vmatprep.mubr.msk.f32.mxu0 %vm3805_vm2, %v3804_v6  ;;  %3297 = vmatpush3.msra.mxu0 %v2277_v12 }
 0x2d3   : > { %3298 = vmatprep.subr.mxu0 %v3804_v6  ;;  %3291 = vmatprep.subr.mxu1 %v3804_v6 }
 0x2d4   : > { %3299 = vmatpush3.msra.mxu0 %v2276_v15  ;;  %3292 = vmatpush3.msra.mxu1 %v2188_v18  ;;  %v2874_v15 = vld [vmem:[#allocation8 + $0x16] ss:$0 sm:$0xff] }
 0x2d5   : > { %3300 = vmatprep.subr.mxu0 %v3804_v6  ;;  %3307 = vmatprep.subr.mxu1 %v3804_v6  ;;  %v1281_v18 = vadd.f32 %v2874_v15, %v4258_v37 }
 0x2d6   : > { %3301 = vmatpush3.msra.mxu0 %v2275_v17 }
 0x2d7   : > { %3302 = vmatprep.subr.mxu0 %v3804_v6 }
 0x2d8   : > { %3303 = vmatpush3.msra.mxu0 %v2274_v13 }
 0x2d9   : > { %3318 = vmatprep.subr.mxu0 %v3804_v6 }
 0x389   : > { %v1995_v21 = vpop.f32.mrf.mxu0  ;;  %v2078_v24 = vpop.f32.mrf.mxu1 }
 0x38a   : > { %v1996_v28 = vadd.f32 %v2895_v20, %v1995_v21  ;;  %v2079_v42 = vadd.f32 %v2897_v30, %v2078_v24 }
 0x38b   : > { %v3262_v32 = vpop.f32.mrf.mxu0  ;;  %v3273_v34 = vpop.f32.mrf.mxu1 }
 0x38c   : > { %v2165_v36 = vadd.f32 %v1996_v28, %v946_v26  ;;  %v2172_v45 = vadd.f32 %v2079_v42, %v1029_v43  ;;  %v2876_v28 = vld [vmem:[#allocation8 + $0x17] ss:$0 sm:$0xff]  ;;  %v2908_v32 = vld [vmem:[#allocation8 + $0xb] ss:$0 sm:$0xff] }
 0x38d   : > { %v1364_v34 = vadd.f32 %v2876_v28, %v4260_v40  ;;  %v2552_v40 = vld [vmem:[#allocation7 + $0x328] sm:$0xff] }
 0x38e   : > { %v2901_v41 = vmul.f32 -1.442695, %v2165_v36  ;;  %v2902_v47 = vmul.f32 -1.442695, %v2172_v45 }
 0x390   : > { %3503 = vpow2.f32 %v2901_v41 }
 0x391   : > { %v2161_v44 = vpop.f32.mrf.mxu0  ;;  %3505 = vpow2.f32 %v2902_v47 }
 0x392   : > { %v2162_v56 = vadd.f32 %v2899_v53, %v2161_v44 }
 0x393   : > { %v3284_v46 = vpop.f32.mrf.mxu0 }
 0x39d   : > { %v3504_v49 = vpop.eup %3503 }
 0x39e   : > { %v2169_v50 = vadd.f32 1.0, %v3504_v49  ;;  %v3506_v29 = vpop.eup %3505  ;;  %v2553_v49 = vld [vmem:[#allocation7 + $0x330] sm:$0xff] }
 0x39f   : > { %v2176_v52 = vadd.f32 1.0, %v3506_v29 }
 0x3a0   : > { %3507 = vrcp.f32 %v2169_v50  ;;  %v2551_v50 = vld [vmem:[#allocation7 + $0x320] sm:$0xff] }
 0x3a1   : > { %3509 = vrcp.f32 %v2176_v52 }
 0x3ad   : > { %v3508_v55 = vpop.eup %3507 }
 0x3ae   : > { %v2179_v31 = vmul.f32 %v3508_v55, %v1112_v54  ;;  %v3510_v58 = vpop.eup %3509 }
 0x3af   : > { %v2182_v23 = vsub.f32 1.0, %v3510_v58  ;;  %v2184_v61 = vmul.f32 %v3510_v58, %v4161_v39  ;;  %v2357_v39 = vld [vmem:[#allocation7 + $0x160] sm:$0xff] }
 0x3b0   : > { %v2180_v57 = vadd.f32 %v2179_v31, %v2162_v56 }
 0x3b2   : > { %3511 = vtanh.f32 %v2180_v57 }
 0x3bf   : > { %v3512_v59 = vpop.eup %3511 }
 0x3c0   : > { %v2183_v60 = vmul.f32 %v3512_v59, %v2182_v23 }
 0x3c2   : > { %v2185_v62 = vadd.f32 %v2184_v61, %v2183_v60 }
 0x3c4   : > { %2903 = vst.msk [vmem:[%s4093_s10 + $0x10] sm:$0xff] %vm371_vm1, %v2185_v62  ;;  %3294 = vmatmul.mubr.msk.f32.vlgmr.msra.gmra.mxu1 %vm371_vm1, %v2185_v62  ;;  %3305 = vmatmul.mubr.msk.f32.vlgmr.msra.gmra.mxu0 %vm371_vm1, %v2185_v62 }
 0x3c5   : > { %3308 = vmatpush3.msra.mxu1 %v2360_v63  ;;  %3315 = vmatprep.mubr.msk.f32.mxu1 %vm3805_vm2, %v3804_v6 }
 0x3c6   : > { %3309 = vmatprep.subr.mxu1 %v3804_v6  ;;  %3326 = vmatprep.mubr.msk.f32.mxu0 %vm3805_vm2, %v3804_v6 }
 0x3c7   : > { %3310 = vmatpush3.msra.mxu1 %v2359_v33  ;;  %3319 = vmatpush3.msra.mxu0 %v2465_v25 }
 0x3c8   : > { %3311 = vmatprep.subr.mxu1 %v3804_v6  ;;  %3320 = vmatprep.subr.mxu0 %v3804_v6 }
 0x3c9   : > { %3312 = vmatpush3.msra.mxu1 %v2358_v0  ;;  %3321 = vmatpush3.msra.mxu0 %v2464_v1 }
 0x3ca   : > { %3313 = vmatprep.subr.mxu1 %v3804_v6  ;;  %3322 = vmatprep.subr.mxu0 %v3804_v6 }
 0x3cb   : > { %3314 = vmatpush3.msra.mxu1 %v2357_v39  ;;  %3323 = vmatpush3.msra.mxu0 %v2463_v2 }
 0x3cc   : > { %3316 = vmatmul.mubr.msk.f32.vlgmr.msra.gmra.mxu1 %vm371_vm1, %v2185_v62  ;;  %3329 = vmatprep.subr.mxu1 %v3804_v6 }
 0x3cd   : > { %3337 = vmatprep.mubr.msk.f32.mxu1 %vm3805_vm2, %v3804_v6  ;;  %3324 = vmatprep.subr.mxu0 %v3804_v6 }
 0x3ce   : > { %3325 = vmatpush3.msra.mxu0 %v2462_v3  ;;  %3330 = vmatpush3.msra.mxu1 %v2554_v4 }
 0x3cf   : > { %3331 = vmatprep.subr.mxu1 %v3804_v6 }
 0x3d0   : > { %3332 = vmatpush3.msra.mxu1 %v2553_v49 }
 0x3d1   : > { %3333 = vmatprep.subr.mxu1 %v3804_v6 }
 0x3d2   : > { %3334 = vmatpush3.msra.mxu1 %v2552_v40 }
 0x3d3   : > { %3335 = vmatprep.subr.mxu1 %v3804_v6 }
 0x3d4   : > { %3336 = vmatpush3.msra.mxu1 %v2551_v50 }
 0x484   : > { %v2269_v8 = vpop.f32.mrf.mxu1  ;;  %v2352_v9 = vpop.f32.mrf.mxu0 }
 0x485   : > { %v2270_v10 = vadd.f32 %v2904_v7, %v2269_v8  ;;  %v2353_v17 = vadd.f32 %v2906_v22, %v2352_v9 }
 0x486   : > { %v3295_v11 = vpop.f32.mrf.mxu1  ;;  %v3306_v12 = vpop.f32.mrf.mxu0 }
 0x487   : > { %v2439_v14 = vadd.f32 %v2270_v10, %v1198_v27  ;;  %v2446_v19 = vadd.f32 %v2353_v17, %v1281_v18 }
 0x489   : > { %v2910_v16 = vmul.f32 -1.442695, %v2439_v14  ;;  %v2911_v21 = vmul.f32 -1.442695, %v2446_v19 }
 0x48b   : > { %3513 = vpow2.f32 %v2910_v16 }
 0x48c   : > { %v2435_v13 = vpop.f32.mrf.mxu1  ;;  %3515 = vpow2.f32 %v2911_v21 }
 0x48d   : > { %v2436_v38 = vadd.f32 %v2908_v32, %v2435_v13 }
 0x48e   : > { %v3317_v20 = vpop.f32.mrf.mxu1 }
 0x498   : > { %v3514_v24 = vpop.eup %3513 }
 0x499   : > { %v2443_v26 = vadd.f32 1.0, %v3514_v24  ;;  %v3516_v35 = vpop.eup %3515 }
 0x49a   : > { %v2450_v30 = vadd.f32 1.0, %v3516_v35 }
 0x49b   : > { %3517 = vrcp.f32 %v2443_v26 }
 0x49c   : > { %3519 = vrcp.f32 %v2450_v30 }
 0x4a8   : > { %v3518_v36 = vpop.eup %3517 }
 0x4a9   : > { %v2453_v37 = vmul.f32 %v3518_v36, %v1364_v34  ;;  %v3520_v42 = vpop.eup %3519 }
 0x4aa   : > { %v2456_v43 = vsub.f32 1.0, %v3520_v42  ;;  %v2458_v46 = vmul.f32 %v3520_v42, %v4184_v48  ;;  %v2913_v48 = vld [vmem:[#allocation8 + $0x18] ss:$0 sm:$0xff] }
 0x4ab   : > { %v2454_v41 = vadd.f32 %v2453_v37, %v2436_v38 }
 0x4ad   : > { %3521 = vtanh.f32 %v2454_v41 }
 0x4ba   : > { %v3522_v44 = vpop.eup %3521 }
 0x4bb   : > { %v2457_v45 = vmul.f32 %v3522_v44, %v2456_v43 }
 0x4bd   : > { %v2459_v47 = vadd.f32 %v2458_v46, %v2457_v45 }
 0x4bf   : > { %2912 = vst.msk [vmem:[%s4093_s10 + $0x18] sm:$0xff] %vm371_vm1, %v2459_v47  ;;  %3327 = vmatmul.mubr.msk.f32.vlgmr.msra.gmra.mxu0 %vm371_vm1, %v2459_v47 }
 0x57f   : > { %v2543_v29 = vpop.f32.mrf.mxu0 }
 0x580   : > { %v2544_v51 = vadd.f32 %v2913_v48, %v2543_v29 }
 0x581   : > { %v3328_v52 = vpop.f32.mrf.mxu0 }
 0x582   : > { %vm2547_vm3 = vcmp.gt.f32.partialorder %v2544_v51, 0.0  ;;  %v2548_v53 = vmul.f32 0.01, %v2544_v51 }
 0x584   : > { %v2549_v54 = vsel %vm2547_vm3, %v2544_v51, %v2548_v53 }
 0x585   : > { %3338 = vmatmul.mubr.msk.f32.vlgmr.msra.gmra.mxu1 %vm371_vm1, %v2549_v54 }
 0x586   : > { %3644 = shalt.err (!%p3641_p2)
}
 0x587   : > { %s3645_s2 = scalar_lea.hbm %s4351_s18, 512  ;;  %s3649_s23 = scalar_lea.hbm %s4512_s3, 1024 }
 0x588   : > { %p3646_p5 = scmp.ne.s32.totalorder %s4351_s18, %s3645_s2  ;;  %p3650_p10 = scmp.lt.s32.totalorder %s4351_s18, %s4512_s3 }
 0x589   : > { %p3651_p6 = scmp.lt.s32.totalorder %s3649_s23, %s3645_s2 }
 0x58a   : > { %p3647_p0 = pnand %p3646_p5, %p4005_p9 }
 0x58b   : > { %p3652_p7 = por %p3651_p6, %p3650_p10 }
 0x58c   : > { %p3648_p11 = pneg %p3647_p0 }
 0x58e   : > { %p3653_p1 = pnand %p3652_p7, %p3648_p11 }
 0x590   : > { %3656 = shalt.err (!%p3653_p1)
}
 0x591   : > { %s3807_s7 = smov 128   ;;  %s3808_s14 = smov 256   ;;  %v2915_v6 = vld [vmem:[#allocation8 + $0x19] ss:$0 sm:$0xff] }
 0x592   : > { %s3809_s10 = smov 8   ;;  %s4513_s29 = sld [smem:[#allocation28_spill]] }
 0x593   : > { %3353 = dma.vmem_to_hbm [thread:$0]  (%p4005_p9), %s4353_s30, 512, %s4351_s18, %s4357_s16, %s3807_s7, %s3808_s14, %s3809_s10  }
 0x594   : > { %s2919_s15 = sshll.u32 %s3777_s24, 1  ;;  %s2658_s0 = sshll.u32 %s4091_s8, 4  ;;  %s2659_s0 = int_to_ptr.vmem [resolvable:$true] %s2658_s0 }
 0x595   : > { %s2654_s5 = sadd.s32 %s3781_s25, %s2919_s15  ;;  %s4514_s2 = sld [smem:[#allocation33_spill]] }
 0x596   : > { %s2920_s4 = sshll.u32 %s2654_s5, 7  ;;  %s2638_s11 = scalar_lea.sflag [#allocation4], %s4065_s17 }
 0x597   : > { %s3657_s9 = scalar_lea.vmem %s2659_s0, 128  ;;  %s3810_s24 = smov [#allocation10]  }
 0x598   : > { %p3658_p8 = scmp.ne.s32.totalorder %s2659_s0, %s3657_s9  ;;  %p4515_p9 = scmp.ne.s32.totalorder %s4513_s29, 0 }
 0x599   : > { %s3661_s25 = sshll.u32 %s3810_s24, 4  ;;  %s3662_s25 = int_to_ptr.vmem [resolvable:$false] %s3661_s25 }
 0x59a   : > { %p3659_p3 = pnand %p3658_p8, %p4515_p9  ;;  %s3663_s30 = scalar_lea.vmem %s3662_s25, 256 }
 0x59b   : > { %s4386_s12 = scalar_lea.hbm %s4514_s2, %s2920_s4  ;;  %p3664_p4 = scmp.lt.s32.totalorder %s2659_s0, %s3662_s25 }
 0x59c   : > { %p3660_p12 = pneg %p3659_p3  ;;  %p3665_p13 = scmp.lt.s32.totalorder %s3663_s30, %s3657_s9 }
 0x59e   : > { %p3666_p2 = por %p3665_p13, %p3664_p4 }
 0x5a0   : > { %p3667_p5 = pnand %p3666_p2, %p3660_p12 }
 0x645   : > { %v2632_v55 = vpop.f32.mrf.mxu1 }
 0x646   : > { %v2633_v56 = vadd.f32 %v2915_v6, %v2632_v55 }
 0x647   : > { %v3339_v31 = vpop.f32.mrf.mxu1 }
 0x648   : > { %2636 = vst.msk [vmem:[%s4091_s8] sm:$0xff] %vm371_vm1, %v2633_v56 }
 0x649   : > { %3670 = shalt.err (!%p3667_p5)
}
 0x64a   : > { %s3671_s8 = scalar_lea.hbm %s4386_s12, 128  ;;  %s3675_s16 = scalar_lea.hbm %s4514_s2, 2048 }
 0x64b   : > { %p3672_p0 = scmp.ne.s32.totalorder %s4386_s12, %s3671_s8  ;;  %p3676_p6 = scmp.lt.s32.totalorder %s4386_s12, %s4514_s2 }
 0x64c   : > { %p3677_p7 = scmp.lt.s32.totalorder %s3675_s16, %s3671_s8 }
 0x64d   : > { %p3673_p11 = pnand %p3672_p0, %p4515_p9 }
 0x64e   : > { %p3678_p1 = por %p3677_p7, %p3676_p6 }
 0x64f   : > { %p3674_p10 = pneg %p3673_p11 }
 0x651   : > { %p3679_p8 = pnand %p3678_p1, %p3674_p10 }
 0x653   : > { %3682 = shalt.err (!%p3679_p8)
}
 0x654   : > { %3352 = dma.vmem_to_hbm [thread:$0]  (%p4515_p9), %s2659_s0, 128, %s4386_s12, %s2638_s11  }
 0x655 PF: > { %s4516_s6 = sld [smem:[#allocation21_spill]]  ;;  %p3382_p3 = scmp.ge.s32.totalorder %s3793_s28, 2 }
 0x656   : > { %p4517_p12 = scmp.ne.s32.totalorder %s4498_s13, 0 }
 0x658   : > { %p3371_p4 = pnand %p3382_p3, %p4517_p12 }
 0x65a   : > { %p3372_p13 = pneg %p3371_p4 }
 0x65b   : > { %s2685_s7 = sand.u32 1, %s4516_s6  }
 0x65c   : > { %s2686_s14 = scalar_lea.sflag [#allocation4], %s2685_s7 }
 0x65d   : > { %3744 = dma.done.wait (%p3372_p13), %s2686_s14, 128  }
 0x65e   : > { %3746 = vsyncadd (%p3372_p13), %s2686_s14, 4294967168  ;;  %s4518_s10 = sld [smem:[#allocation19_spill]] }
 0x65f   : > { %s4519_s15 = sld [smem:[#allocation29_spill]] }
 0x664   : > { %s2694_s5 = sand.u32 1, %s4518_s10  }
 0x665   : > { %p4520_p2 = scmp.ne.s32.totalorder %s4519_s15, 0  ;;  %s2695_s29 = scalar_lea.sflag [#allocation12], %s2694_s5 }
 0x667   : > { %p3374_p5 = pnand %p3382_p3, %p4520_p2 }
 0x669   : > { %p3375_p0 = pneg %p3374_p5 }
 0x66b   : > { %3748 = dma.done.wait (%p3375_p0), %s2695_s29, 512  }
 0x66c   : > { %3750 = vsyncadd (%p3375_p0), %s2695_s29, 4294966784  ;;  %s29_s28 = sadd.s32 1, %s3793_s28   ;;  %s4521_s4 = sld [smem:[#allocation20_spill]] }
 0x66d   : > { %p26_p9 = scmp.ge.s32.totalorder %s29_s28, 18   ;;  %s4522_s20 = sld [smem:[#allocation26_spill]] }
 0x66e   : > { %s4523_s13 = sld [smem:[#allocation22_spill]]  ;;  %s4528_s18 = smov %s3757_s19 }
 0x66f   : > { %s4524_s23 = sld [smem:[#allocation27_spill]]  ;;  %s4530_s21 = smov %s3769_s22 }
 0x670   : > { %s4525_s24 = sld [smem:[#allocation23_spill]]  ;;  %s4532_s25 = smov %s3789_s27 }
 0x671   : > { %s4526_s26 = sld [smem:[#allocation24_spill]] }
 0x672   : > { %s4527_s0 = sld [smem:[#allocation25_spill]]  ;;  %s4529_s19 = smov %s4521_s4 }
 0x674   : > { %s4531_s22 = smov %s4523_s13  ;;  %28 = sbr.rel (!%p26_p9) target bundleno = 20 (0x14), region = 176 }
 0x678   : > { %s4533_s27 = smov %s4527_s0 }
 0x679   :  { %2700 = vsyncpa [#allocation3], 1 }
 0x67a   :  { %2702 = vsyncpa [#allocation3 + $0x1], 1 }
 0x67b   :  { %2703 = vsyncpa [#allocation6], 1 }
 0x67c   :  { %2705 = vsyncpa [#allocation6 + $0x1], 1 }
 0x67d   :  { %2706 = vsyncpa [#allocation9], 1 }
 0x67e   :  { %2707 = vsyncpa [#allocation4], 1 }
 0x67f   :  { %2709 = vsyncpa [#allocation4 + $0x1], 1 }
 0x680   :  { %2710 = vsyncpa [#allocation12], 1 }
 0x681   :  { %2712 = vsyncpa [#allocation12 + $0x1], 1 }

</bundles_post_ra>
